<compile_context>
chip_gen: v7x
topology: tpu7x:2x2x1
jax: 0.10.0
libtpu: 0.0.40
codegen_flags: <defaults>
</compile_context>

<pallas_src>
import math

import jax
import jax.numpy as jnp
from jax.experimental import pallas as pl
from jax.experimental.pallas import tpu as pltpu


# ---------------------------------------------------------------------------
# Fused Pallas kernel: all LSTM layers + final Linear in one invocation
# ---------------------------------------------------------------------------
def make_fused_lstm_fc_kernel(T, B, H, n_step, meta):
    num_layers = len(meta["layers"])

    def kernel(x_ref, w_ref, out_ref, seq_sc):
        h = jnp.zeros((B, H), jnp.float32)

        for l in range(num_layers):                              # static unroll
            m = meta["layers"][l]
            in_dim = m["in_dim"]
            # Static, 8-row-aligned views into the single packed weight array.
            wih = w_ref[m["wih_off"]:m["wih_off"] + in_dim, :]   # (in_dim, 4H)
            whh = w_ref[m["whh_off"]:m["whh_off"] + H, :]        # (H, 4H)
            b = w_ref[m["b_off"]:m["b_off"] + 1, :]              # (1, 4H)

            # Hoisted input projection + bias: one matmul covers all T steps.
            src = x_ref[...] if l == 0 else seq_sc[...]
            gates_x = jnp.dot(src, wih,
                              preferred_element_type=jnp.float32) + b  # (T*B,4H)

            h = jnp.zeros((B, H), jnp.float32)
            c = jnp.zeros((B, H), jnp.float32)

            for t in range(T):                                   # static unroll
                gates = gates_x[t * B:(t + 1) * B, :] + jnp.dot(
                    h, whh, preferred_element_type=jnp.float32)  # (B, 4H)

                # Gate layout (reordered in wrapper): [i, f, o, g]
                s = jax.nn.sigmoid(gates[:, :3 * H])             # one EUP pass
                g_g = jnp.tanh(gates[:, 3 * H:])
                i_g = s[:, 0 * H:1 * H]
                f_g = s[:, 1 * H:2 * H]
                o_g = s[:, 2 * H:3 * H]

                c = f_g * c + i_g * g_g
                h = o_g * jnp.tanh(c)

                if l < num_layers - 1:
                    # Keep this layer's hidden sequence in VMEM for the next
                    # layer's hoisted projection; never touches HBM.
                    seq_sc[t * B:(t + 1) * B, :] = h

        # Final Linear on the last layer's last-step hidden state only.
        # fc weights/bias are zero-padded to 4H lanes, so the full-width matmul
        # is valid and we just slice the first n_step output lanes.
        fcw = w_ref[meta["fcw_off"]:meta["fcw_off"] + H, :]      # (H, 4H)
        fcb = w_ref[meta["fcb_off"]:meta["fcb_off"] + 1, :]      # (1, 4H)
        full = jnp.dot(h, fcw, preferred_element_type=jnp.float32) + fcb
        out_ref[...] = full[:, :n_step].astype(out_ref.dtype)

    return kernel


# ---------------------------------------------------------------------------
# One-time parameter prep: gate reorder + transpose + pack into ONE array
# ---------------------------------------------------------------------------
def _reorder_gates(w):
    """Reorder the leading 4H gate axis from PyTorch [i,f,g,o] to [i,f,o,g]."""
    H = w.shape[0] // 4
    return jnp.concatenate([w[:2 * H], w[3 * H:], w[2 * H:3 * H]], axis=0)


def pack_params(params, hidden_dim, n_step):
    """Pack all weights/biases into one lane-dense (rows, 4H) f32 array.

    Every segment is padded to an 8-row (sublane) boundary so each in-kernel
    static slice starts aligned; the FC head is zero-padded along lanes to 4H
    so the whole model is a single VMEM-resident operand (one DMA, not nine).
    Returns (packed_array, meta) where meta holds static row offsets.
    """
    H, G = hidden_dim, 4 * hidden_dim
    blocks, meta, row = [], {"layers": []}, 0

    def add(a):
        nonlocal row
        a = jnp.asarray(a, jnp.float32)
        r = a.shape[0]
        rpad, cpad = (-r) % 8, G - a.shape[1]
        if rpad or cpad:
            a = jnp.pad(a, ((0, rpad), (0, cpad)))
        blocks.append(a)
        off = row
        row += r + rpad
        return off

    for layer in params["layers"]:
        wih_t = _reorder_gates(layer["wih"]).T                    # (in_dim, 4H)
        whh_t = _reorder_gates(layer["whh"]).T                    # (H, 4H)
        bias = (_reorder_gates(layer["bih"]) +
                _reorder_gates(layer["bhh"]))[None, :]            # (1, 4H)
        meta["layers"].append({
            "in_dim": wih_t.shape[0],
            "wih_off": add(wih_t),
            "whh_off": add(whh_t),
            "b_off": add(bias),
        })
    meta["fcw_off"] = add(params["fc_w"].T)                       # (H, n_step)
    meta["fcb_off"] = add(params["fc_b"][None, :])                # (1, n_step)
    return jnp.concatenate(blocks, axis=0), meta


# ---------------------------------------------------------------------------
# Forward builder (meta is static; packed weights are a single runtime array)
# ---------------------------------------------------------------------------
def build_forward(T, B, F, H, n_step, meta):
    kernel = make_fused_lstm_fc_kernel(T, B, H, n_step, meta)
    call = pl.pallas_call(
        kernel,
        out_shape=jax.ShapeDtypeStruct((B, n_step), jnp.float32),
        in_specs=[pl.BlockSpec(memory_space=pltpu.MemorySpace.VMEM),
                  pl.BlockSpec(memory_space=pltpu.MemorySpace.VMEM)],
        out_specs=pl.BlockSpec(memory_space=pltpu.MemorySpace.VMEM),
        scratch_shapes=[pltpu.VMEM((T * B, H), jnp.float32)],
    )

    @jax.jit
    def forward(x, packed):
        # Time-major, flattened (T*B, F) so the hoisted projection is 1 matmul.
        xs = jnp.transpose(x, (1, 0, 2)).reshape(T * B, F).astype(jnp.float32)
        return call(xs, packed)

    return forward


# ---------------------------------------------------------------------------
# Pure-JAX reference (mirrors torch.nn.LSTM + Linear semantics)
# ---------------------------------------------------------------------------
def lstm_reference(x, params):
    B, T, _ = x.shape
    seq = x
    for layer in params["layers"]:
        wih, whh, bih, bhh = layer["wih"], layer["whh"], layer["bih"], layer["bhh"]
        H = whh.shape[1]

        def step(carry, xt):
            h, c = carry
            gates = xt @ wih.T + h @ whh.T + bih + bhh
            i, f, g, o = jnp.split(gates, 4, axis=-1)
            i, f, g, o = (jax.nn.sigmoid(i), jax.nn.sigmoid(f),
                          jnp.tanh(g), jax.nn.sigmoid(o))
            c = f * c + i * g
            h = o * jnp.tanh(c)
            return (h, c), h

        init = (jnp.zeros((B, H), jnp.float32), jnp.zeros((B, H), jnp.float32))
        _, ys = jax.lax.scan(step, init, jnp.transpose(seq, (1, 0, 2)))
        seq = jnp.transpose(ys, (1, 0, 2))
    return seq[:, -1, :] @ params["fc_w"].T + params["fc_b"]


# ---------------------------------------------------------------------------
# Deterministic parameter init (PyTorch-style uniform(-1/sqrt(H), 1/sqrt(H)))
# ---------------------------------------------------------------------------
def init_params(key, n_feature, hidden_dim, num_layers, n_step):
    params = {"layers": []}
    bound = 1.0 / math.sqrt(hidden_dim)
    for l in range(num_layers):
        in_dim = n_feature if l == 0 else hidden_dim
        key, k1, k2, k3, k4 = jax.random.split(key, 5)
        params["layers"].append({
            "wih": jax.random.uniform(k1, (4 * hidden_dim, in_dim),
                                      jnp.float32, -bound, bound),
            "whh": jax.random.uniform(k2, (4 * hidden_dim, hidden_dim),
                                      jnp.float32, -bound, bound),
            "bih": jax.random.uniform(k3, (4 * hidden_dim,),
                                      jnp.float32, -bound, bound),
            "bhh": jax.random.uniform(k4, (4 * hidden_dim,),
                                      jnp.float32, -bound, bound),
        })
    key, k1, k2 = jax.random.split(key, 3)
    params["fc_w"] = jax.random.uniform(k1, (n_step, hidden_dim),
                                        jnp.float32, -bound, bound)
    params["fc_b"] = jax.random.uniform(k2, (n_step,),
                                        jnp.float32, -bound, bound)
    return params


if __name__ == "__main__":
    # Small shapes implied by the module: batch=2, seq=8, n_feature=4,
    # hidden_dim=32, num_layers=2, n_step=8.
    B, T, n_feature, hidden_dim, num_layers, n_step = 2, 8, 4, 32, 2, 8

    key = jax.random.PRNGKey(0)
    key, xkey = jax.random.split(key)
    x = jax.random.normal(xkey, (B, T, n_feature), jnp.float32)
    params = init_params(key, n_feature, hidden_dim, num_layers, n_step)

    packed, meta = pack_params(params, hidden_dim, n_step)
    packed = jax.block_until_ready(packed)

    forward = build_forward(T, B, n_feature, hidden_dim, n_step, meta)
    out = jax.block_until_ready(forward(x, packed))
    ref = jax.block_until_ready(lstm_reference(x, params))

    assert out.shape == (B, n_step), out.shape
    assert jnp.allclose(out, ref, atol=1e-5, rtol=1e-5), \
        f"max abs err {jnp.max(jnp.abs(out - ref))}"

    print("KERNEL_OK")
</pallas_src>

<mosaic_0001>
module attributes {stable_mosaic.version = 11 : i64} {
  func.func @kernel(%arg0: memref<16x4xf32, #tpu.memory_space<vmem>>, %arg1: memref<160x128xf32, #tpu.memory_space<vmem>>, %arg2: memref<2x8xf32, #tpu.memory_space<vmem>>, %arg3: memref<16x32xf32, #tpu.memory_space<vmem>>) attributes {dimension_semantics = [], scalar_prefetch = 0 : i64, scratch_operands = 1 : i64, tpu.core_type = #tpu.core_type<tc>} {
    %c0 = arith.constant 0 : index
    %c0_0 = arith.constant 0 : index
    %0 = vector.load %arg1[%c0, %c0_0] : memref<160x128xf32, #tpu.memory_space<vmem>>, vector<4x128xf32>
    %c8 = arith.constant 8 : index
    %c0_1 = arith.constant 0 : index
    %1 = vector.load %arg1[%c8, %c0_1] : memref<160x128xf32, #tpu.memory_space<vmem>>, vector<32x128xf32>
    %c40 = arith.constant 40 : index
    %c0_2 = arith.constant 0 : index
    %2 = vector.load %arg1[%c40, %c0_2] : memref<160x128xf32, #tpu.memory_space<vmem>>, vector<1x128xf32>
    %c0_3 = arith.constant 0 : index
    %c0_4 = arith.constant 0 : index
    %3 = vector.load %arg0[%c0_3, %c0_4] : memref<16x4xf32, #tpu.memory_space<vmem>>, vector<16x4xf32>
    %cst = arith.constant dense<0.000000e+00> : vector<16x128xf32>
    %4 = tpu.matmul %3, %0, %cst {dimension_numbers = #tpu.dot_dimension_numbers<[1], [0], [0], [1], [0, 0, 1, 1], [], []>} : vector<16x4xf32>, vector<4x128xf32>, vector<16x128xf32> -> vector<16x128xf32>
    %5 = vector.broadcast %2 : vector<1x128xf32> to vector<16x128xf32>
    %6 = arith.addf %4, %5 : vector<16x128xf32>
    %cst_5 = arith.constant 0.000000e+00 : f32
    %7 = vector.broadcast %cst_5 : f32 to vector<2x32xf32>
    %cst_6 = arith.constant 0.000000e+00 : f32
    %8 = vector.broadcast %cst_6 : f32 to vector<2x32xf32>
    %9 = vector.extract_strided_slice %6 {offsets = [0, 0], sizes = [2, 128], strides = [1, 1]} : vector<16x128xf32> to vector<2x128xf32>
    %cst_7 = arith.constant dense<0.000000e+00> : vector<2x128xf32>
    %10 = tpu.matmul %7, %1, %cst_7 {dimension_numbers = #tpu.dot_dimension_numbers<[1], [0], [0], [1], [0, 0, 1, 1], [], []>} : vector<2x32xf32>, vector<32x128xf32>, vector<2x128xf32> -> vector<2x128xf32>
    %11 = arith.addf %9, %10 : vector<2x128xf32>
    %12 = vector.extract_strided_slice %11 {offsets = [0, 0], sizes = [2, 96], strides = [1, 1]} : vector<2x128xf32> to vector<2x96xf32>
    %13 = arith.negf %12 : vector<2x96xf32>
    %14 = math.exp %13 : vector<2x96xf32>
    %cst_8 = arith.constant 1.000000e+00 : f32
    %15 = vector.broadcast %cst_8 : f32 to vector<2x96xf32>
    %16 = arith.addf %15, %14 : vector<2x96xf32>
    %17 = arith.divf %15, %16 : vector<2x96xf32>
    %18 = vector.extract_strided_slice %11 {offsets = [0, 96], sizes = [2, 32], strides = [1, 1]} : vector<2x128xf32> to vector<2x32xf32>
    %19 = math.tanh %18 : vector<2x32xf32>
    %20 = vector.extract_strided_slice %17 {offsets = [0, 0], sizes = [2, 32], strides = [1, 1]} : vector<2x96xf32> to vector<2x32xf32>
    %21 = vector.extract_strided_slice %17 {offsets = [0, 32], sizes = [2, 32], strides = [1, 1]} : vector<2x96xf32> to vector<2x32xf32>
    %22 = vector.extract_strided_slice %17 {offsets = [0, 64], sizes = [2, 32], strides = [1, 1]} : vector<2x96xf32> to vector<2x32xf32>
    %23 = arith.mulf %21, %8 : vector<2x32xf32>
    %24 = arith.mulf %20, %19 : vector<2x32xf32>
    %25 = arith.addf %23, %24 : vector<2x32xf32>
    %26 = math.tanh %25 : vector<2x32xf32>
    %27 = arith.mulf %22, %26 : vector<2x32xf32>
    %c0_9 = arith.constant 0 : index
    %c0_10 = arith.constant 0 : index
    %28 = vector.load %arg3[%c0_9, %c0_10] : memref<16x32xf32, #tpu.memory_space<vmem>>, vector<2x32xf32>
    tpu.vector_store %arg3[%c0_9, %c0_10], %27 {strides = array<i32>} : memref<16x32xf32, #tpu.memory_space<vmem>>, vector<2x32xf32>,
    %29 = vector.extract_strided_slice %6 {offsets = [2, 0], sizes = [2, 128], strides = [1, 1]} : vector<16x128xf32> to vector<2x128xf32>
    %cst_11 = arith.constant dense<0.000000e+00> : vector<2x128xf32>
    %30 = tpu.matmul %27, %1, %cst_11 {dimension_numbers = #tpu.dot_dimension_numbers<[1], [0], [0], [1], [0, 0, 1, 1], [], []>} : vector<2x32xf32>, vector<32x128xf32>, vector<2x128xf32> -> vector<2x128xf32>
    %31 = arith.addf %29, %30 : vector<2x128xf32>
    %32 = vector.extract_strided_slice %31 {offsets = [0, 0], sizes = [2, 96], strides = [1, 1]} : vector<2x128xf32> to vector<2x96xf32>
    %33 = arith.negf %32 : vector<2x96xf32>
    %34 = math.exp %33 : vector<2x96xf32>
    %cst_12 = arith.constant 1.000000e+00 : f32
    %35 = vector.broadcast %cst_12 : f32 to vector<2x96xf32>
    %36 = arith.addf %35, %34 : vector<2x96xf32>
    %37 = arith.divf %35, %36 : vector<2x96xf32>
    %38 = vector.extract_strided_slice %31 {offsets = [0, 96], sizes = [2, 32], strides = [1, 1]} : vector<2x128xf32> to vector<2x32xf32>
    %39 = math.tanh %38 : vector<2x32xf32>
    %40 = vector.extract_strided_slice %37 {offsets = [0, 0], sizes = [2, 32], strides = [1, 1]} : vector<2x96xf32> to vector<2x32xf32>
    %41 = vector.extract_strided_slice %37 {offsets = [0, 32], sizes = [2, 32], strides = [1, 1]} : vector<2x96xf32> to vector<2x32xf32>
    %42 = vector.extract_strided_slice %37 {offsets = [0, 64], sizes = [2, 32], strides = [1, 1]} : vector<2x96xf32> to vector<2x32xf32>
    %43 = arith.mulf %41, %25 : vector<2x32xf32>
    %44 = arith.mulf %40, %39 : vector<2x32xf32>
    %45 = arith.addf %43, %44 : vector<2x32xf32>
    %46 = math.tanh %45 : vector<2x32xf32>
    %47 = arith.mulf %42, %46 : vector<2x32xf32>
    %c2 = arith.constant 2 : index
    %c0_13 = arith.constant 0 : index
    %48 = vector.load %arg3[%c2, %c0_13] : memref<16x32xf32, #tpu.memory_space<vmem>>, vector<2x32xf32>
    tpu.vector_store %arg3[%c2, %c0_13], %47 {strides = array<i32>} : memref<16x32xf32, #tpu.memory_space<vmem>>, vector<2x32xf32>,
    %49 = vector.extract_strided_slice %6 {offsets = [4, 0], sizes = [2, 128], strides = [1, 1]} : vector<16x128xf32> to vector<2x128xf32>
    %cst_14 = arith.constant dense<0.000000e+00> : vector<2x128xf32>
    %50 = tpu.matmul %47, %1, %cst_14 {dimension_numbers = #tpu.dot_dimension_numbers<[1], [0], [0], [1], [0, 0, 1, 1], [], []>} : vector<2x32xf32>, vector<32x128xf32>, vector<2x128xf32> -> vector<2x128xf32>
    %51 = arith.addf %49, %50 : vector<2x128xf32>
    %52 = vector.extract_strided_slice %51 {offsets = [0, 0], sizes = [2, 96], strides = [1, 1]} : vector<2x128xf32> to vector<2x96xf32>
    %53 = arith.negf %52 : vector<2x96xf32>
    %54 = math.exp %53 : vector<2x96xf32>
    %cst_15 = arith.constant 1.000000e+00 : f32
    %55 = vector.broadcast %cst_15 : f32 to vector<2x96xf32>
    %56 = arith.addf %55, %54 : vector<2x96xf32>
    %57 = arith.divf %55, %56 : vector<2x96xf32>
    %58 = vector.extract_strided_slice %51 {offsets = [0, 96], sizes = [2, 32], strides = [1, 1]} : vector<2x128xf32> to vector<2x32xf32>
    %59 = math.tanh %58 : vector<2x32xf32>
    %60 = vector.extract_strided_slice %57 {offsets = [0, 0], sizes = [2, 32], strides = [1, 1]} : vector<2x96xf32> to vector<2x32xf32>
    %61 = vector.extract_strided_slice %57 {offsets = [0, 32], sizes = [2, 32], strides = [1, 1]} : vector<2x96xf32> to vector<2x32xf32>
    %62 = vector.extract_strided_slice %57 {offsets = [0, 64], sizes = [2, 32], strides = [1, 1]} : vector<2x96xf32> to vector<2x32xf32>
    %63 = arith.mulf %61, %45 : vector<2x32xf32>
    %64 = arith.mulf %60, %59 : vector<2x32xf32>
    %65 = arith.addf %63, %64 : vector<2x32xf32>
    %66 = math.tanh %65 : vector<2x32xf32>
    %67 = arith.mulf %62, %66 : vector<2x32xf32>
    %c4 = arith.constant 4 : index
    %c0_16 = arith.constant 0 : index
    %68 = vector.load %arg3[%c4, %c0_16] : memref<16x32xf32, #tpu.memory_space<vmem>>, vector<2x32xf32>
    tpu.vector_store %arg3[%c4, %c0_16], %67 {strides = array<i32>} : memref<16x32xf32, #tpu.memory_space<vmem>>, vector<2x32xf32>,
    %69 = vector.extract_strided_slice %6 {offsets = [6, 0], sizes = [2, 128], strides = [1, 1]} : vector<16x128xf32> to vector<2x128xf32>
    %cst_17 = arith.constant dense<0.000000e+00> : vector<2x128xf32>
    %70 = tpu.matmul %67, %1, %cst_17 {dimension_numbers = #tpu.dot_dimension_numbers<[1], [0], [0], [1], [0, 0, 1, 1], [], []>} : vector<2x32xf32>, vector<32x128xf32>, vector<2x128xf32> -> vector<2x128xf32>
    %71 = arith.addf %69, %70 : vector<2x128xf32>
    %72 = vector.extract_strided_slice %71 {offsets = [0, 0], sizes = [2, 96], strides = [1, 1]} : vector<2x128xf32> to vector<2x96xf32>
    %73 = arith.negf %72 : vector<2x96xf32>
    %74 = math.exp %73 : vector<2x96xf32>
    %cst_18 = arith.constant 1.000000e+00 : f32
    %75 = vector.broadcast %cst_18 : f32 to vector<2x96xf32>
    %76 = arith.addf %75, %74 : vector<2x96xf32>
    %77 = arith.divf %75, %76 : vector<2x96xf32>
    %78 = vector.extract_strided_slice %71 {offsets = [0, 96], sizes = [2, 32], strides = [1, 1]} : vector<2x128xf32> to vector<2x32xf32>
    %79 = math.tanh %78 : vector<2x32xf32>
    %80 = vector.extract_strided_slice %77 {offsets = [0, 0], sizes = [2, 32], strides = [1, 1]} : vector<2x96xf32> to vector<2x32xf32>
    %81 = vector.extract_strided_slice %77 {offsets = [0, 32], sizes = [2, 32], strides = [1, 1]} : vector<2x96xf32> to vector<2x32xf32>
    %82 = vector.extract_strided_slice %77 {offsets = [0, 64], sizes = [2, 32], strides = [1, 1]} : vector<2x96xf32> to vector<2x32xf32>
    %83 = arith.mulf %81, %65 : vector<2x32xf32>
    %84 = arith.mulf %80, %79 : vector<2x32xf32>
    %85 = arith.addf %83, %84 : vector<2x32xf32>
    %86 = math.tanh %85 : vector<2x32xf32>
    %87 = arith.mulf %82, %86 : vector<2x32xf32>
    %c6 = arith.constant 6 : index
    %c0_19 = arith.constant 0 : index
    %88 = vector.load %arg3[%c6, %c0_19] : memref<16x32xf32, #tpu.memory_space<vmem>>, vector<2x32xf32>
    tpu.vector_store %arg3[%c6, %c0_19], %87 {strides = array<i32>} : memref<16x32xf32, #tpu.memory_space<vmem>>, vector<2x32xf32>,
    %89 = vector.extract_strided_slice %6 {offsets = [8, 0], sizes = [2, 128], strides = [1, 1]} : vector<16x128xf32> to vector<2x128xf32>
    %cst_20 = arith.constant dense<0.000000e+00> : vector<2x128xf32>
    %90 = tpu.matmul %87, %1, %cst_20 {dimension_numbers = #tpu.dot_dimension_numbers<[1], [0], [0], [1], [0, 0, 1, 1], [], []>} : vector<2x32xf32>, vector<32x128xf32>, vector<2x128xf32> -> vector<2x128xf32>
    %91 = arith.addf %89, %90 : vector<2x128xf32>
    %92 = vector.extract_strided_slice %91 {offsets = [0, 0], sizes = [2, 96], strides = [1, 1]} : vector<2x128xf32> to vector<2x96xf32>
    %93 = arith.negf %92 : vector<2x96xf32>
    %94 = math.exp %93 : vector<2x96xf32>
    %cst_21 = arith.constant 1.000000e+00 : f32
    %95 = vector.broadcast %cst_21 : f32 to vector<2x96xf32>
    %96 = arith.addf %95, %94 : vector<2x96xf32>
    %97 = arith.divf %95, %96 : vector<2x96xf32>
    %98 = vector.extract_strided_slice %91 {offsets = [0, 96], sizes = [2, 32], strides = [1, 1]} : vector<2x128xf32> to vector<2x32xf32>
    %99 = math.tanh %98 : vector<2x32xf32>
    %100 = vector.extract_strided_slice %97 {offsets = [0, 0], sizes = [2, 32], strides = [1, 1]} : vector<2x96xf32> to vector<2x32xf32>
    %101 = vector.extract_strided_slice %97 {offsets = [0, 32], sizes = [2, 32], strides = [1, 1]} : vector<2x96xf32> to vector<2x32xf32>
    %102 = vector.extract_strided_slice %97 {offsets = [0, 64], sizes = [2, 32], strides = [1, 1]} : vector<2x96xf32> to vector<2x32xf32>
    %103 = arith.mulf %101, %85 : vector<2x32xf32>
    %104 = arith.mulf %100, %99 : vector<2x32xf32>
    %105 = arith.addf %103, %104 : vector<2x32xf32>
    %106 = math.tanh %105 : vector<2x32xf32>
    %107 = arith.mulf %102, %106 : vector<2x32xf32>
    %c8_22 = arith.constant 8 : index
    %c0_23 = arith.constant 0 : index
    %108 = vector.load %arg3[%c8_22, %c0_23] : memref<16x32xf32, #tpu.memory_space<vmem>>, vector<2x32xf32>
    tpu.vector_store %arg3[%c8_22, %c0_23], %107 {strides = array<i32>} : memref<16x32xf32, #tpu.memory_space<vmem>>, vector<2x32xf32>,
    %109 = vector.extract_strided_slice %6 {offsets = [10, 0], sizes = [2, 128], strides = [1, 1]} : vector<16x128xf32> to vector<2x128xf32>
    %cst_24 = arith.constant dense<0.000000e+00> : vector<2x128xf32>
    %110 = tpu.matmul %107, %1, %cst_24 {dimension_numbers = #tpu.dot_dimension_numbers<[1], [0], [0], [1], [0, 0, 1, 1], [], []>} : vector<2x32xf32>, vector<32x128xf32>, vector<2x128xf32> -> vector<2x128xf32>
    %111 = arith.addf %109, %110 : vector<2x128xf32>
    %112 = vector.extract_strided_slice %111 {offsets = [0, 0], sizes = [2, 96], strides = [1, 1]} : vector<2x128xf32> to vector<2x96xf32>
    %113 = arith.negf %112 : vector<2x96xf32>
    %114 = math.exp %113 : vector<2x96xf32>
    %cst_25 = arith.constant 1.000000e+00 : f32
    %115 = vector.broadcast %cst_25 : f32 to vector<2x96xf32>
    %116 = arith.addf %115, %114 : vector<2x96xf32>
    %117 = arith.divf %115, %116 : vector<2x96xf32>
    %118 = vector.extract_strided_slice %111 {offsets = [0, 96], sizes = [2, 32], strides = [1, 1]} : vector<2x128xf32> to vector<2x32xf32>
    %119 = math.tanh %118 : vector<2x32xf32>
    %120 = vector.extract_strided_slice %117 {offsets = [0, 0], sizes = [2, 32], strides = [1, 1]} : vector<2x96xf32> to vector<2x32xf32>
    %121 = vector.extract_strided_slice %117 {offsets = [0, 32], sizes = [2, 32], strides = [1, 1]} : vector<2x96xf32> to vector<2x32xf32>
    %122 = vector.extract_strided_slice %117 {offsets = [0, 64], sizes = [2, 32], strides = [1, 1]} : vector<2x96xf32> to vector<2x32xf32>
    %123 = arith.mulf %121, %105 : vector<2x32xf32>
    %124 = arith.mulf %120, %119 : vector<2x32xf32>
    %125 = arith.addf %123, %124 : vector<2x32xf32>
    %126 = math.tanh %125 : vector<2x32xf32>
    %127 = arith.mulf %122, %126 : vector<2x32xf32>
    %c10 = arith.constant 10 : index
    %c0_26 = arith.constant 0 : index
    %128 = vector.load %arg3[%c10, %c0_26] : memref<16x32xf32, #tpu.memory_space<vmem>>, vector<2x32xf32>
    tpu.vector_store %arg3[%c10, %c0_26], %127 {strides = array<i32>} : memref<16x32xf32, #tpu.memory_space<vmem>>, vector<2x32xf32>,
    %129 = vector.extract_strided_slice %6 {offsets = [12, 0], sizes = [2, 128], strides = [1, 1]} : vector<16x128xf32> to vector<2x128xf32>
    %cst_27 = arith.constant dense<0.000000e+00> : vector<2x128xf32>
    %130 = tpu.matmul %127, %1, %cst_27 {dimension_numbers = #tpu.dot_dimension_numbers<[1], [0], [0], [1], [0, 0, 1, 1], [], []>} : vector<2x32xf32>, vector<32x128xf32>, vector<2x128xf32> -> vector<2x128xf32>
    %131 = arith.addf %129, %130 : vector<2x128xf32>
    %132 = vector.extract_strided_slice %131 {offsets = [0, 0], sizes = [2, 96], strides = [1, 1]} : vector<2x128xf32> to vector<2x96xf32>
    %133 = arith.negf %132 : vector<2x96xf32>
    %134 = math.exp %133 : vector<2x96xf32>
    %cst_28 = arith.constant 1.000000e+00 : f32
    %135 = vector.broadcast %cst_28 : f32 to vector<2x96xf32>
    %136 = arith.addf %135, %134 : vector<2x96xf32>
    %137 = arith.divf %135, %136 : vector<2x96xf32>
    %138 = vector.extract_strided_slice %131 {offsets = [0, 96], sizes = [2, 32], strides = [1, 1]} : vector<2x128xf32> to vector<2x32xf32>
    %139 = math.tanh %138 : vector<2x32xf32>
    %140 = vector.extract_strided_slice %137 {offsets = [0, 0], sizes = [2, 32], strides = [1, 1]} : vector<2x96xf32> to vector<2x32xf32>
    %141 = vector.extract_strided_slice %137 {offsets = [0, 32], sizes = [2, 32], strides = [1, 1]} : vector<2x96xf32> to vector<2x32xf32>
    %142 = vector.extract_strided_slice %137 {offsets = [0, 64], sizes = [2, 32], strides = [1, 1]} : vector<2x96xf32> to vector<2x32xf32>
    %143 = arith.mulf %141, %125 : vector<2x32xf32>
    %144 = arith.mulf %140, %139 : vector<2x32xf32>
    %145 = arith.addf %143, %144 : vector<2x32xf32>
    %146 = math.tanh %145 : vector<2x32xf32>
    %147 = arith.mulf %142, %146 : vector<2x32xf32>
    %c12 = arith.constant 12 : index
    %c0_29 = arith.constant 0 : index
    %148 = vector.load %arg3[%c12, %c0_29] : memref<16x32xf32, #tpu.memory_space<vmem>>, vector<2x32xf32>
    tpu.vector_store %arg3[%c12, %c0_29], %147 {strides = array<i32>} : memref<16x32xf32, #tpu.memory_space<vmem>>, vector<2x32xf32>,
    %149 = vector.extract_strided_slice %6 {offsets = [14, 0], sizes = [2, 128], strides = [1, 1]} : vector<16x128xf32> to vector<2x128xf32>
    %cst_30 = arith.constant dense<0.000000e+00> : vector<2x128xf32>
    %150 = tpu.matmul %147, %1, %cst_30 {dimension_numbers = #tpu.dot_dimension_numbers<[1], [0], [0], [1], [0, 0, 1, 1], [], []>} : vector<2x32xf32>, vector<32x128xf32>, vector<2x128xf32> -> vector<2x128xf32>
    %151 = arith.addf %149, %150 : vector<2x128xf32>
    %152 = vector.extract_strided_slice %151 {offsets = [0, 0], sizes = [2, 96], strides = [1, 1]} : vector<2x128xf32> to vector<2x96xf32>
    %153 = arith.negf %152 : vector<2x96xf32>
    %154 = math.exp %153 : vector<2x96xf32>
    %cst_31 = arith.constant 1.000000e+00 : f32
    %155 = vector.broadcast %cst_31 : f32 to vector<2x96xf32>
    %156 = arith.addf %155, %154 : vector<2x96xf32>
    %157 = arith.divf %155, %156 : vector<2x96xf32>
    %158 = vector.extract_strided_slice %151 {offsets = [0, 96], sizes = [2, 32], strides = [1, 1]} : vector<2x128xf32> to vector<2x32xf32>
    %159 = math.tanh %158 : vector<2x32xf32>
    %160 = vector.extract_strided_slice %157 {offsets = [0, 0], sizes = [2, 32], strides = [1, 1]} : vector<2x96xf32> to vector<2x32xf32>
    %161 = vector.extract_strided_slice %157 {offsets = [0, 32], sizes = [2, 32], strides = [1, 1]} : vector<2x96xf32> to vector<2x32xf32>
    %162 = vector.extract_strided_slice %157 {offsets = [0, 64], sizes = [2, 32], strides = [1, 1]} : vector<2x96xf32> to vector<2x32xf32>
    %163 = arith.mulf %161, %145 : vector<2x32xf32>
    %164 = arith.mulf %160, %159 : vector<2x32xf32>
    %165 = arith.addf %163, %164 : vector<2x32xf32>
    %166 = math.tanh %165 : vector<2x32xf32>
    %167 = arith.mulf %162, %166 : vector<2x32xf32>
    %c14 = arith.constant 14 : index
    %c0_32 = arith.constant 0 : index
    %168 = vector.load %arg3[%c14, %c0_32] : memref<16x32xf32, #tpu.memory_space<vmem>>, vector<2x32xf32>
    tpu.vector_store %arg3[%c14, %c0_32], %167 {strides = array<i32>} : memref<16x32xf32, #tpu.memory_space<vmem>>, vector<2x32xf32>,
    %c48 = arith.constant 48 : index
    %c0_33 = arith.constant 0 : index
    %169 = vector.load %arg1[%c48, %c0_33] : memref<160x128xf32, #tpu.memory_space<vmem>>, vector<32x128xf32>
    %c80 = arith.constant 80 : index
    %c0_34 = arith.constant 0 : index
    %170 = vector.load %arg1[%c80, %c0_34] : memref<160x128xf32, #tpu.memory_space<vmem>>, vector<32x128xf32>
    %c112 = arith.constant 112 : index
    %c0_35 = arith.constant 0 : index
    %171 = vector.load %arg1[%c112, %c0_35] : memref<160x128xf32, #tpu.memory_space<vmem>>, vector<1x128xf32>
    %c0_36 = arith.constant 0 : index
    %c0_37 = arith.constant 0 : index
    %172 = vector.load %arg3[%c0_36, %c0_37] : memref<16x32xf32, #tpu.memory_space<vmem>>, vector<16x32xf32>
    %cst_38 = arith.constant dense<0.000000e+00> : vector<16x128xf32>
    %173 = tpu.matmul %172, %169, %cst_38 {dimension_numbers = #tpu.dot_dimension_numbers<[1], [0], [0], [1], [0, 0, 1, 1], [], []>} : vector<16x32xf32>, vector<32x128xf32>, vector<16x128xf32> -> vector<16x128xf32>
    %174 = vector.broadcast %171 : vector<1x128xf32> to vector<16x128xf32>
    %175 = arith.addf %173, %174 : vector<16x128xf32>
    %cst_39 = arith.constant 0.000000e+00 : f32
    %176 = vector.broadcast %cst_39 : f32 to vector<2x32xf32>
    %cst_40 = arith.constant 0.000000e+00 : f32
    %177 = vector.broadcast %cst_40 : f32 to vector<2x32xf32>
    %178 = vector.extract_strided_slice %175 {offsets = [0, 0], sizes = [2, 128], strides = [1, 1]} : vector<16x128xf32> to vector<2x128xf32>
    %cst_41 = arith.constant dense<0.000000e+00> : vector<2x128xf32>
    %179 = tpu.matmul %176, %170, %cst_41 {dimension_numbers = #tpu.dot_dimension_numbers<[1], [0], [0], [1], [0, 0, 1, 1], [], []>} : vector<2x32xf32>, vector<32x128xf32>, vector<2x128xf32> -> vector<2x128xf32>
    %180 = arith.addf %178, %179 : vector<2x128xf32>
    %181 = vector.extract_strided_slice %180 {offsets = [0, 0], sizes = [2, 96], strides = [1, 1]} : vector<2x128xf32> to vector<2x96xf32>
    %182 = arith.negf %181 : vector<2x96xf32>
    %183 = math.exp %182 : vector<2x96xf32>
    %cst_42 = arith.constant 1.000000e+00 : f32
    %184 = vector.broadcast %cst_42 : f32 to vector<2x96xf32>
    %185 = arith.addf %184, %183 : vector<2x96xf32>
    %186 = arith.divf %184, %185 : vector<2x96xf32>
    %187 = vector.extract_strided_slice %180 {offsets = [0, 96], sizes = [2, 32], strides = [1, 1]} : vector<2x128xf32> to vector<2x32xf32>
    %188 = math.tanh %187 : vector<2x32xf32>
    %189 = vector.extract_strided_slice %186 {offsets = [0, 0], sizes = [2, 32], strides = [1, 1]} : vector<2x96xf32> to vector<2x32xf32>
    %190 = vector.extract_strided_slice %186 {offsets = [0, 32], sizes = [2, 32], strides = [1, 1]} : vector<2x96xf32> to vector<2x32xf32>
    %191 = vector.extract_strided_slice %186 {offsets = [0, 64], sizes = [2, 32], strides = [1, 1]} : vector<2x96xf32> to vector<2x32xf32>
    %192 = arith.mulf %190, %177 : vector<2x32xf32>
    %193 = arith.mulf %189, %188 : vector<2x32xf32>
    %194 = arith.addf %192, %193 : vector<2x32xf32>
    %195 = math.tanh %194 : vector<2x32xf32>
    %196 = arith.mulf %191, %195 : vector<2x32xf32>
    %197 = vector.extract_strided_slice %175 {offsets = [2, 0], sizes = [2, 128], strides = [1, 1]} : vector<16x128xf32> to vector<2x128xf32>
    %cst_43 = arith.constant dense<0.000000e+00> : vector<2x128xf32>
    %198 = tpu.matmul %196, %170, %cst_43 {dimension_numbers = #tpu.dot_dimension_numbers<[1], [0], [0], [1], [0, 0, 1, 1], [], []>} : vector<2x32xf32>, vector<32x128xf32>, vector<2x128xf32> -> vector<2x128xf32>
    %199 = arith.addf %197, %198 : vector<2x128xf32>
    %200 = vector.extract_strided_slice %199 {offsets = [0, 0], sizes = [2, 96], strides = [1, 1]} : vector<2x128xf32> to vector<2x96xf32>
    %201 = arith.negf %200 : vector<2x96xf32>
    %202 = math.exp %201 : vector<2x96xf32>
    %cst_44 = arith.constant 1.000000e+00 : f32
    %203 = vector.broadcast %cst_44 : f32 to vector<2x96xf32>
    %204 = arith.addf %203, %202 : vector<2x96xf32>
    %205 = arith.divf %203, %204 : vector<2x96xf32>
    %206 = vector.extract_strided_slice %199 {offsets = [0, 96], sizes = [2, 32], strides = [1, 1]} : vector<2x128xf32> to vector<2x32xf32>
    %207 = math.tanh %206 : vector<2x32xf32>
    %208 = vector.extract_strided_slice %205 {offsets = [0, 0], sizes = [2, 32], strides = [1, 1]} : vector<2x96xf32> to vector<2x32xf32>
    %209 = vector.extract_strided_slice %205 {offsets = [0, 32], sizes = [2, 32], strides = [1, 1]} : vector<2x96xf32> to vector<2x32xf32>
    %210 = vector.extract_strided_slice %205 {offsets = [0, 64], sizes = [2, 32], strides = [1, 1]} : vector<2x96xf32> to vector<2x32xf32>
    %211 = arith.mulf %209, %194 : vector<2x32xf32>
    %212 = arith.mulf %208, %207 : vector<2x32xf32>
    %213 = arith.addf %211, %212 : vector<2x32xf32>
    %214 = math.tanh %213 : vector<2x32xf32>
    %215 = arith.mulf %210, %214 : vector<2x32xf32>
    %216 = vector.extract_strided_slice %175 {offsets = [4, 0], sizes = [2, 128], strides = [1, 1]} : vector<16x128xf32> to vector<2x128xf32>
    %cst_45 = arith.constant dense<0.000000e+00> : vector<2x128xf32>
    %217 = tpu.matmul %215, %170, %cst_45 {dimension_numbers = #tpu.dot_dimension_numbers<[1], [0], [0], [1], [0, 0, 1, 1], [], []>} : vector<2x32xf32>, vector<32x128xf32>, vector<2x128xf32> -> vector<2x128xf32>
    %218 = arith.addf %216, %217 : vector<2x128xf32>
    %219 = vector.extract_strided_slice %218 {offsets = [0, 0], sizes = [2, 96], strides = [1, 1]} : vector<2x128xf32> to vector<2x96xf32>
    %220 = arith.negf %219 : vector<2x96xf32>
    %221 = math.exp %220 : vector<2x96xf32>
    %cst_46 = arith.constant 1.000000e+00 : f32
    %222 = vector.broadcast %cst_46 : f32 to vector<2x96xf32>
    %223 = arith.addf %222, %221 : vector<2x96xf32>
    %224 = arith.divf %222, %223 : vector<2x96xf32>
    %225 = vector.extract_strided_slice %218 {offsets = [0, 96], sizes = [2, 32], strides = [1, 1]} : vector<2x128xf32> to vector<2x32xf32>
    %226 = math.tanh %225 : vector<2x32xf32>
    %227 = vector.extract_strided_slice %224 {offsets = [0, 0], sizes = [2, 32], strides = [1, 1]} : vector<2x96xf32> to vector<2x32xf32>
    %228 = vector.extract_strided_slice %224 {offsets = [0, 32], sizes = [2, 32], strides = [1, 1]} : vector<2x96xf32> to vector<2x32xf32>
    %229 = vector.extract_strided_slice %224 {offsets = [0, 64], sizes = [2, 32], strides = [1, 1]} : vector<2x96xf32> to vector<2x32xf32>
    %230 = arith.mulf %228, %213 : vector<2x32xf32>
    %231 = arith.mulf %227, %226 : vector<2x32xf32>
    %232 = arith.addf %230, %231 : vector<2x32xf32>
    %233 = math.tanh %232 : vector<2x32xf32>
    %234 = arith.mulf %229, %233 : vector<2x32xf32>
    %235 = vector.extract_strided_slice %175 {offsets = [6, 0], sizes = [2, 128], strides = [1, 1]} : vector<16x128xf32> to vector<2x128xf32>
    %cst_47 = arith.constant dense<0.000000e+00> : vector<2x128xf32>
    %236 = tpu.matmul %234, %170, %cst_47 {dimension_numbers = #tpu.dot_dimension_numbers<[1], [0], [0], [1], [0, 0, 1, 1], [], []>} : vector<2x32xf32>, vector<32x128xf32>, vector<2x128xf32> -> vector<2x128xf32>
    %237 = arith.addf %235, %236 : vector<2x128xf32>
    %238 = vector.extract_strided_slice %237 {offsets = [0, 0], sizes = [2, 96], strides = [1, 1]} : vector<2x128xf32> to vector<2x96xf32>
    %239 = arith.negf %238 : vector<2x96xf32>
    %240 = math.exp %239 : vector<2x96xf32>
    %cst_48 = arith.constant 1.000000e+00 : f32
    %241 = vector.broadcast %cst_48 : f32 to vector<2x96xf32>
    %242 = arith.addf %241, %240 : vector<2x96xf32>
    %243 = arith.divf %241, %242 : vector<2x96xf32>
    %244 = vector.extract_strided_slice %237 {offsets = [0, 96], sizes = [2, 32], strides = [1, 1]} : vector<2x128xf32> to vector<2x32xf32>
    %245 = math.tanh %244 : vector<2x32xf32>
    %246 = vector.extract_strided_slice %243 {offsets = [0, 0], sizes = [2, 32], strides = [1, 1]} : vector<2x96xf32> to vector<2x32xf32>
    %247 = vector.extract_strided_slice %243 {offsets = [0, 32], sizes = [2, 32], strides = [1, 1]} : vector<2x96xf32> to vector<2x32xf32>
    %248 = vector.extract_strided_slice %243 {offsets = [0, 64], sizes = [2, 32], strides = [1, 1]} : vector<2x96xf32> to vector<2x32xf32>
    %249 = arith.mulf %247, %232 : vector<2x32xf32>
    %250 = arith.mulf %246, %245 : vector<2x32xf32>
    %251 = arith.addf %249, %250 : vector<2x32xf32>
    %252 = math.tanh %251 : vector<2x32xf32>
    %253 = arith.mulf %248, %252 : vector<2x32xf32>
    %254 = vector.extract_strided_slice %175 {offsets = [8, 0], sizes = [2, 128], strides = [1, 1]} : vector<16x128xf32> to vector<2x128xf32>
    %cst_49 = arith.constant dense<0.000000e+00> : vector<2x128xf32>
    %255 = tpu.matmul %253, %170, %cst_49 {dimension_numbers = #tpu.dot_dimension_numbers<[1], [0], [0], [1], [0, 0, 1, 1], [], []>} : vector<2x32xf32>, vector<32x128xf32>, vector<2x128xf32> -> vector<2x128xf32>
    %256 = arith.addf %254, %255 : vector<2x128xf32>
    %257 = vector.extract_strided_slice %256 {offsets = [0, 0], sizes = [2, 96], strides = [1, 1]} : vector<2x128xf32> to vector<2x96xf32>
    %258 = arith.negf %257 : vector<2x96xf32>
    %259 = math.exp %258 : vector<2x96xf32>
    %cst_50 = arith.constant 1.000000e+00 : f32
    %260 = vector.broadcast %cst_50 : f32 to vector<2x96xf32>
    %261 = arith.addf %260, %259 : vector<2x96xf32>
    %262 = arith.divf %260, %261 : vector<2x96xf32>
    %263 = vector.extract_strided_slice %256 {offsets = [0, 96], sizes = [2, 32], strides = [1, 1]} : vector<2x128xf32> to vector<2x32xf32>
    %264 = math.tanh %263 : vector<2x32xf32>
    %265 = vector.extract_strided_slice %262 {offsets = [0, 0], sizes = [2, 32], strides = [1, 1]} : vector<2x96xf32> to vector<2x32xf32>
    %266 = vector.extract_strided_slice %262 {offsets = [0, 32], sizes = [2, 32], strides = [1, 1]} : vector<2x96xf32> to vector<2x32xf32>
    %267 = vector.extract_strided_slice %262 {offsets = [0, 64], sizes = [2, 32], strides = [1, 1]} : vector<2x96xf32> to vector<2x32xf32>
    %268 = arith.mulf %266, %251 : vector<2x32xf32>
    %269 = arith.mulf %265, %264 : vector<2x32xf32>
    %270 = arith.addf %268, %269 : vector<2x32xf32>
    %271 = math.tanh %270 : vector<2x32xf32>
    %272 = arith.mulf %267, %271 : vector<2x32xf32>
    %273 = vector.extract_strided_slice %175 {offsets = [10, 0], sizes = [2, 128], strides = [1, 1]} : vector<16x128xf32> to vector<2x128xf32>
    %cst_51 = arith.constant dense<0.000000e+00> : vector<2x128xf32>
    %274 = tpu.matmul %272, %170, %cst_51 {dimension_numbers = #tpu.dot_dimension_numbers<[1], [0], [0], [1], [0, 0, 1, 1], [], []>} : vector<2x32xf32>, vector<32x128xf32>, vector<2x128xf32> -> vector<2x128xf32>
    %275 = arith.addf %273, %274 : vector<2x128xf32>
    %276 = vector.extract_strided_slice %275 {offsets = [0, 0], sizes = [2, 96], strides = [1, 1]} : vector<2x128xf32> to vector<2x96xf32>
    %277 = arith.negf %276 : vector<2x96xf32>
    %278 = math.exp %277 : vector<2x96xf32>
    %cst_52 = arith.constant 1.000000e+00 : f32
    %279 = vector.broadcast %cst_52 : f32 to vector<2x96xf32>
    %280 = arith.addf %279, %278 : vector<2x96xf32>
    %281 = arith.divf %279, %280 : vector<2x96xf32>
    %282 = vector.extract_strided_slice %275 {offsets = [0, 96], sizes = [2, 32], strides = [1, 1]} : vector<2x128xf32> to vector<2x32xf32>
    %283 = math.tanh %282 : vector<2x32xf32>
    %284 = vector.extract_strided_slice %281 {offsets = [0, 0], sizes = [2, 32], strides = [1, 1]} : vector<2x96xf32> to vector<2x32xf32>
    %285 = vector.extract_strided_slice %281 {offsets = [0, 32], sizes = [2, 32], strides = [1, 1]} : vector<2x96xf32> to vector<2x32xf32>
    %286 = vector.extract_strided_slice %281 {offsets = [0, 64], sizes = [2, 32], strides = [1, 1]} : vector<2x96xf32> to vector<2x32xf32>
    %287 = arith.mulf %285, %270 : vector<2x32xf32>
    %288 = arith.mulf %284, %283 : vector<2x32xf32>
    %289 = arith.addf %287, %288 : vector<2x32xf32>
    %290 = math.tanh %289 : vector<2x32xf32>
    %291 = arith.mulf %286, %290 : vector<2x32xf32>
    %292 = vector.extract_strided_slice %175 {offsets = [12, 0], sizes = [2, 128], strides = [1, 1]} : vector<16x128xf32> to vector<2x128xf32>
    %cst_53 = arith.constant dense<0.000000e+00> : vector<2x128xf32>
    %293 = tpu.matmul %291, %170, %cst_53 {dimension_numbers = #tpu.dot_dimension_numbers<[1], [0], [0], [1], [0, 0, 1, 1], [], []>} : vector<2x32xf32>, vector<32x128xf32>, vector<2x128xf32> -> vector<2x128xf32>
    %294 = arith.addf %292, %293 : vector<2x128xf32>
    %295 = vector.extract_strided_slice %294 {offsets = [0, 0], sizes = [2, 96], strides = [1, 1]} : vector<2x128xf32> to vector<2x96xf32>
    %296 = arith.negf %295 : vector<2x96xf32>
    %297 = math.exp %296 : vector<2x96xf32>
    %cst_54 = arith.constant 1.000000e+00 : f32
    %298 = vector.broadcast %cst_54 : f32 to vector<2x96xf32>
    %299 = arith.addf %298, %297 : vector<2x96xf32>
    %300 = arith.divf %298, %299 : vector<2x96xf32>
    %301 = vector.extract_strided_slice %294 {offsets = [0, 96], sizes = [2, 32], strides = [1, 1]} : vector<2x128xf32> to vector<2x32xf32>
    %302 = math.tanh %301 : vector<2x32xf32>
    %303 = vector.extract_strided_slice %300 {offsets = [0, 0], sizes = [2, 32], strides = [1, 1]} : vector<2x96xf32> to vector<2x32xf32>
    %304 = vector.extract_strided_slice %300 {offsets = [0, 32], sizes = [2, 32], strides = [1, 1]} : vector<2x96xf32> to vector<2x32xf32>
    %305 = vector.extract_strided_slice %300 {offsets = [0, 64], sizes = [2, 32], strides = [1, 1]} : vector<2x96xf32> to vector<2x32xf32>
    %306 = arith.mulf %304, %289 : vector<2x32xf32>
    %307 = arith.mulf %303, %302 : vector<2x32xf32>
    %308 = arith.addf %306, %307 : vector<2x32xf32>
    %309 = math.tanh %308 : vector<2x32xf32>
    %310 = arith.mulf %305, %309 : vector<2x32xf32>
    %311 = vector.extract_strided_slice %175 {offsets = [14, 0], sizes = [2, 128], strides = [1, 1]} : vector<16x128xf32> to vector<2x128xf32>
    %cst_55 = arith.constant dense<0.000000e+00> : vector<2x128xf32>
    %312 = tpu.matmul %310, %170, %cst_55 {dimension_numbers = #tpu.dot_dimension_numbers<[1], [0], [0], [1], [0, 0, 1, 1], [], []>} : vector<2x32xf32>, vector<32x128xf32>, vector<2x128xf32> -> vector<2x128xf32>
    %313 = arith.addf %311, %312 : vector<2x128xf32>
    %314 = vector.extract_strided_slice %313 {offsets = [0, 0], sizes = [2, 96], strides = [1, 1]} : vector<2x128xf32> to vector<2x96xf32>
    %315 = arith.negf %314 : vector<2x96xf32>
    %316 = math.exp %315 : vector<2x96xf32>
    %cst_56 = arith.constant 1.000000e+00 : f32
    %317 = vector.broadcast %cst_56 : f32 to vector<2x96xf32>
    %318 = arith.addf %317, %316 : vector<2x96xf32>
    %319 = arith.divf %317, %318 : vector<2x96xf32>
    %320 = vector.extract_strided_slice %313 {offsets = [0, 96], sizes = [2, 32], strides = [1, 1]} : vector<2x128xf32> to vector<2x32xf32>
    %321 = math.tanh %320 : vector<2x32xf32>
    %322 = vector.extract_strided_slice %319 {offsets = [0, 0], sizes = [2, 32], strides = [1, 1]} : vector<2x96xf32> to vector<2x32xf32>
    %323 = vector.extract_strided_slice %319 {offsets = [0, 32], sizes = [2, 32], strides = [1, 1]} : vector<2x96xf32> to vector<2x32xf32>
    %324 = vector.extract_strided_slice %319 {offsets = [0, 64], sizes = [2, 32], strides = [1, 1]} : vector<2x96xf32> to vector<2x32xf32>
    %325 = arith.mulf %323, %308 : vector<2x32xf32>
    %326 = arith.mulf %322, %321 : vector<2x32xf32>
    %327 = arith.addf %325, %326 : vector<2x32xf32>
    %328 = math.tanh %327 : vector<2x32xf32>
    %329 = arith.mulf %324, %328 : vector<2x32xf32>
    %c120 = arith.constant 120 : index
    %c0_57 = arith.constant 0 : index
    %330 = vector.load %arg1[%c120, %c0_57] : memref<160x128xf32, #tpu.memory_space<vmem>>, vector<32x128xf32>
    %c152 = arith.constant 152 : index
    %c0_58 = arith.constant 0 : index
    %331 = vector.load %arg1[%c152, %c0_58] : memref<160x128xf32, #tpu.memory_space<vmem>>, vector<1x128xf32>
    %cst_59 = arith.constant dense<0.000000e+00> : vector<2x128xf32>
    %332 = tpu.matmul %329, %330, %cst_59 {dimension_numbers = #tpu.dot_dimension_numbers<[1], [0], [0], [1], [0, 0, 1, 1], [], []>} : vector<2x32xf32>, vector<32x128xf32>, vector<2x128xf32> -> vector<2x128xf32>
    %333 = vector.broadcast %331 : vector<1x128xf32> to vector<2x128xf32>
    %334 = arith.addf %332, %333 : vector<2x128xf32>
    %335 = vector.extract_strided_slice %334 {offsets = [0, 0], sizes = [2, 8], strides = [1, 1]} : vector<2x128xf32> to vector<2x8xf32>
    %c0_60 = arith.constant 0 : index
    %c0_61 = arith.constant 0 : index
    %336 = vector.load %arg2[%c0_60, %c0_61] : memref<2x8xf32, #tpu.memory_space<vmem>>, vector<2x8xf32>
    tpu.vector_store %arg2[%c0_60, %c0_61], %335 {strides = array<i32>} : memref<2x8xf32, #tpu.memory_space<vmem>>, vector<2x8xf32>,
    return
  }
}

</mosaic_0001>

<bundles_post_ra>
// kernel: forward.1
= control target key start
LH: loop header
LB: loop body
LE: loop exit
PB: predicated region body
PF: predicated region fallthrough
CT: control target
= control target key end

     0   :  { %7 = vsyncpa [#allocation4], 0  ;;  %s2966_s0 = inlined_call_operand.vmem [shape: f32[16,4], index: 0, kind: input, shape index: {}]   ;;  %s2967_s1 = inlined_call_operand.hbm [shape: f32[160,128], index: 1, kind: input, shape index: {}]   ;;  %s2968_s2 = inlined_call_operand.hbm [shape: f32[2,8], index: 2, kind: output, shape index: {}]  }
   0x1   :  { %8 = vsyncpa [#allocation5], 0  ;;  %s2668_s9 = smov [#allocation3]   ;;  %s2620_s13 = scalar_lea.hbm %s2967_s1, 2560 }
   0x2   :  { %s16_s10 = sshll.u32 %s2668_s9, 4  ;;  %p2621_p0 = scmp.ne.s32.totalorder %s2967_s1, %s2620_s13  ;;  %s17_s10 = int_to_ptr.vmem [resolvable:$true] %s16_s10 }
   0x3   :  { %p2624_p1 = scmp.lt.u32.totalorder %s2620_s13, %s2967_s1 }
   0x5   :  { %p2626_p2 = pnand %p2624_p1, %p2621_p0 }
   0x7   :  { %2629 = shalt.err (!%p2626_p2)
}
   0x8   :  { %s2630_s18 = scalar_lea.vmem %s17_s10, 2560  ;;  %p2635_p4 = scmp.lt.s32.totalorder %s17_s10, %s17_s10 }
   0x9   :  { %p2631_p3 = scmp.ne.s32.totalorder %s17_s10, %s2630_s18  ;;  %p2636_p5 = scmp.lt.s32.totalorder %s2630_s18, %s2630_s18 }
   0xb   :  { %p2637_p6 = por %p2636_p5, %p2635_p4 }
   0xd   :  { %p2638_p7 = pnand %p2637_p6, %p2631_p3 }
   0xf   :  { %2641 = shalt.err (!%p2638_p7)
}
  0x10   :  { %s2669_s19 = smov 128   ;;  %s2670_s20 = smov 8  }
  0x11   :  { %22 = dma.hbm_to_vmem [thread:$0]  %s2967_s1, 2560, %s17_s10, [#allocation4], %s2669_s19, %s2669_s19, %s2670_s20  }
  0x12   :  { %2664 = dma.done.wait [#allocation4], 2560  }
  0x13   :  { %2665 = vsyncadd [#allocation4], 4294964736  ;;  %v2671_v0 = vmov 0.0|0.0   ;;  %vm2672_vm0 = vmmov 0   ;;  %v2673_v1 = vmov 0.0   ;;  %vm45_vm1 = vcmask 1043456  }
  0x14   :  { %2373 = vmatprep.subr.bf16.mxu1 %v2671_v0  ;;  %2183 = vmatprep.mubr.msk.f32.mxu1 %vm2672_vm0, %v2673_v1  ;;  %vm38_vm2 = vcmask 31744   ;;  %v27_v2 = vld [vmem:[#allocation3 + $0x8] sm:$0xff]  ;;  %v28_v3 = vld [vmem:[#allocation3 + $0x10] sm:$0xff]  ;;  %v26_v4 = vld [vmem:[#allocation3] sm:$0xf]  ;;  %s2675_s26 = smov 64  }
  0x15   :  { %v2707_v5 = vpack.c.bf16 %v28_v3, %v27_v2  ;;  %2170 = vmatprep.subr.msk.mxu0 %vm45_vm1, %v26_v4  ;;  %v32_v6 = vld [vmem:[%s2966_s0] sm:$0xff]  ;;  %v33_v7 = vld [vmem:[%s2966_s0 + $0x8] sm:$0xff]  ;;  %v30_v9 = vld [vmem:[#allocation3 + $0x20] sm:$0xff]  ;;  %s2674_s0 = smov 32   ;;  %vm227_vm3 = vcmask 254976   ;;  %vm124_vm4 = vcmask 261120  }
  0x16   :  { %v29_v8 = vld [vmem:[#allocation3 + $0x18] sm:$0xff]  ;;  %2171 = vmatpush3.msk.msra.mxu0 %vm45_vm1, %v26_v4  ;;  %2172 = vmatprep.mubr.msk.f32.mxu0 %vm38_vm2, %v32_v6  ;;  %v2037_v11 = vld [vmem:[#allocation3 + $0x28] ss:$0 sm:$0xff]  ;;  %vm336_vm5 = vcmask 257026   ;;  %vm560_vm6 = vcmask 261126   ;;  %vm448_vm7 = vcmask 259076  }
  0x17   :  { %2375 = vmatpush3.bf16.msra.mxu1 %v2707_v5  ;;  %2173 = vmatmul.mubr.msk.f32.vlgmr.msra.gmra.mrb[0].mxu0 %vm38_vm2, %v33_v7  ;;  %v2716_v10 = vpack.c.bf16 %v30_v9, %v29_v8  ;;  %s2676_s27 = smov [#allocation6]   ;;  %vm2020_vm8 = vcmask 58368  }
  0x18   :  { %2376 = vmatprep.subr.bf16.mxu1 %v2671_v0  ;;  %2379 = vmatprep.subr.bf16.mxu0 %v2671_v0  ;;  %s2028_s28 = sshll.u32 %s2676_s27, 4  ;;  %s2029_s28 = int_to_ptr.vmem [resolvable:$true] %s2028_s28 }
  0x19   :  { %2381 = vmatpush3.bf16.msra.mxu0 %v2707_v5  ;;  %2194 = vmatprep.mubr.msk.f32.mxu0 %vm2672_vm0, %v2673_v1  ;;  %s2642_s29 = scalar_lea.vmem %s2029_s28, 32  ;;  %p2647_p9 = scmp.lt.s32.totalorder %s2029_s28, %s2029_s28 }
  0x1a   :  { %2382 = vmatprep.subr.bf16.mxu0 %v2671_v0  ;;  %p2643_p8 = scmp.ne.s32.totalorder %s2029_s28, %s2642_s29  ;;  %p2648_p10 = scmp.lt.s32.totalorder %s2642_s29, %s2642_s29 }
  0x1b   :  { %2378 = vmatpush3.bf16.msra.mxu1 %v2716_v10 }
  0x1c   :  { %2385 = vmatprep.subr.bf16.mxu1 %v2671_v0  ;;  %p2649_p11 = por %p2648_p10, %p2647_p9 }
  0x1d   :  { %2384 = vmatpush3.bf16.msra.mxu0 %v2716_v10 }
  0x1e   :  { %2184 = vmatmul.mubr.f32.vlgmr.msra.gmra.mrb[0].mxu1 %v2673_v1  ;;  %2391 = vmatprep.subr.bf16.mxu0 %v2671_v0  ;;  %p2650_p12 = pnand %p2649_p11, %p2643_p8 }
  0x1f   :  { %2387 = vmatpush3.bf16.msra.mxu1 %v2707_v5  ;;  %2205 = vmatprep.mubr.msk.f32.mxu1 %vm2672_vm0, %v2673_v1 }
  0x20   :  { %2388 = vmatprep.subr.bf16.mxu1 %v2671_v0 }
  0x23   :  { %2390 = vmatpush3.bf16.msra.mxu1 %v2716_v10 }
  0x24   :  { %2397 = vmatprep.subr.bf16.mxu1 %v2671_v0 }
  0xea   :  { %v2174_v12 = vpop.f32.mrb[0].mxu0 }
  0xeb   :  { %v2735_v13 = vadd.f32 %v2174_v12, %v2037_v11  ;;  %v115_v14 = vpop.f32.mrb[1].mxu0 }
  0xec   :  { %v2737_v15 = vadd.f32 %v2037_v11, %v115_v14 }
  0xf1   :  { %v194_v16 = vpop.f32.mrb[0].mxu1 }
  0xf2   :  { %v198_v17 = vadd.f32 %v194_v16, %v2737_v15  ;;  %v2185_v18 = vpop.f32.mrb[1].mxu1 }
  0xf4   :  { %2492 = vtanh.f32 %v198_v17  ;;  %v2041_v20 = vmul.f32 -1.442695, %v198_v17 }
  0xf6   :  { %2494 = vpow2.f32 %v2041_v20 }
  0xfe   :  { %v2493_v19 = vpop.eup %2492 }
  0xff   :  { %208 = vrot.lane.b32.xlu0 %v2493_v19, %s2674_s0 }
 0x100   :  { %v2495_v21 = vpop.eup %2494 }
 0x101   :  { %v202_v22 = vadd.f32 1.0, %v2495_v21 }
 0x103   :  { %2496 = vrcp.f32 %v202_v22 }
 0x10d   :  { %v2497_v23 = vpop.eup %2496 }
 0x10e   :  { %v206_v26 = vmul.f32 0.0, %v2497_v23 }
 0x171   :  { %v209_v24 = vpop.permute.xlu0 %208 }
 0x172   :  { %v211_v25 = vmul.f32 %v2497_v23, %v209_v24 }
 0x174   :  { %213 = vrot.lane.b32.xlu0 %v211_v25, %s2674_s0 }
 0x1e6   :  { %v214_v27 = vpop.permute.xlu0 %213 }
 0x1e7   :  { %v216_v28 = vadd.f32 %v214_v27, %v206_v26 }
 0x1e9   :  { %2498 = vtanh.f32 %v216_v28  ;;  %v313_v44 = vrot.slane %v216_v28, 6 }
 0x1f3   :  { %v2499_v29 = vpop.eup %2498 }
 0x1f4   :  { %219 = vrot.lane.b32.xlu1 %v2499_v29, %s2674_s0 }
 0x266   :  { %v220_v30 = vpop.permute.xlu1 %219 }
 0x267   :  { %v222_v31 = vmul.f32 %v2497_v23, %v220_v30 }
 0x269   :  { %224 = vrot.lane.b32.xlu1 %v222_v31, %s2675_s26 }
 0x2db   :  { %v225_v32 = vpop.permute.xlu1 %224 }
 0x2dc   :  { %228 = vst.msk [vmem:[#allocation2] sm:$0x3] %vm227_vm3, %v225_v32  ;;  %2195 = vmatmul.mubr.msk.f32.vlgmr.msra.gmra.mrb[2].mxu0 %vm124_vm4, %v225_v32 }
 0x2dd   :  { %2393 = vmatpush3.bf16.msra.mxu0 %v2707_v5  ;;  %2216 = vmatprep.mubr.msk.f32.mxu0 %vm2672_vm0, %v2673_v1 }
 0x2de   :  { %2394 = vmatprep.subr.bf16.mxu0 %v2671_v0 }
 0x2e1   :  { %2396 = vmatpush3.bf16.msra.mxu0 %v2716_v10 }
 0x2e2   :  { %2403 = vmatprep.subr.bf16.mxu0 %v2671_v0 }
 0x3af   :  { %v297_v33 = vpop.f32.mrb[2].mxu0 }
 0x3b0   :  { %v302_v34 = vrot.slane %v297_v33, 6  ;;  %v2196_v35 = vpop.f32.mrb[3].mxu0 }
 0x3b2   :  { %v304_v36 = vadd.f32 %v302_v34, %v2737_v15 }
 0x3b4   :  { %2500 = vtanh.f32 %v304_v36  ;;  %v2043_v38 = vmul.f32 -1.442695, %v304_v36 }
 0x3b6   :  { %2502 = vpow2.f32 %v2043_v38 }
 0x3be   :  { %v2501_v37 = vpop.eup %2500 }
 0x3bf   :  { %317 = vrot.lane.b32.xlu0 %v2501_v37, %s2674_s0 }
 0x3c0   :  { %v2503_v39 = vpop.eup %2502 }
 0x3c1   :  { %v308_v40 = vadd.f32 1.0, %v2503_v39 }
 0x3c3   :  { %2504 = vrcp.f32 %v308_v40 }
 0x3cd   :  { %v2505_v41 = vpop.eup %2504 }
 0x3ce   :  { %v315_v45 = vmul.f32 %v2505_v41, %v313_v44 }
 0x431   :  { %v318_v42 = vpop.permute.xlu0 %317 }
 0x432   :  { %v320_v43 = vmul.f32 %v2505_v41, %v318_v42 }
 0x434   :  { %322 = vrot.lane.b32.xlu1 %v320_v43, %s2674_s0 }
 0x4a6   :  { %v323_v46 = vpop.permute.xlu1 %322 }
 0x4a7   :  { %v325_v47 = vadd.f32 %v323_v46, %v315_v45 }
 0x4a9   :  { %2506 = vtanh.f32 %v325_v47  ;;  %v425_v2 = vrot.slane %v325_v47, 6 }
 0x4b3   :  { %v2507_v48 = vpop.eup %2506 }
 0x4b4   :  { %328 = vrot.lane.b32.xlu0 %v2507_v48, %s2674_s0 }
 0x526   :  { %v329_v49 = vpop.permute.xlu0 %328 }
 0x527   :  { %v2756_v50 = vmul.f32 %v2505_v41, %v329_v49 }
 0x529   :  { %v338_v51 = vrot.slane %v2756_v50, 2 }
 0x52b   :  { %339 = vrot.lane.b32.xlu1 %v338_v51, %s2675_s26 }
 0x59d   :  { %v340_v52 = vpop.permute.xlu1 %339 }
 0x59e   :  { %2206 = vmatmul.mubr.msk.f32.vlgmr.msra.gmra.mrb[2].mxu1 %vm124_vm4, %v340_v52 }
 0x59f   :  { %2399 = vmatpush3.bf16.msra.mxu1 %v2707_v5  ;;  %2227 = vmatprep.mubr.msk.f32.mxu1 %vm2672_vm0, %v2673_v1 }
 0x5a0   :  { %2400 = vmatprep.subr.bf16.mxu1 %v2671_v0 }
 0x5a3   :  { %2402 = vmatpush3.bf16.msra.mxu1 %v2716_v10 }
 0x5a4   :  { %2409 = vmatprep.subr.bf16.mxu1 %v2671_v0 }
 0x671   :  { %v409_v53 = vpop.f32.mrb[2].mxu1 }
 0x672   :  { %v414_v54 = vrot.slane %v409_v53, 4  ;;  %v2207_v55 = vpop.f32.mrb[3].mxu1 }
 0x674   :  { %v416_v56 = vadd.f32 %v414_v54, %v2737_v15 }
 0x676   :  { %2508 = vtanh.f32 %v416_v56  ;;  %v2045_v58 = vmul.f32 -1.442695, %v416_v56 }
 0x678   :  { %2510 = vpow2.f32 %v2045_v58 }
 0x680   :  { %v2509_v57 = vpop.eup %2508 }
 0x681   :  { %429 = vrot.lane.b32.xlu0 %v2509_v57, %s2674_s0 }
 0x682   :  { %v2511_v59 = vpop.eup %2510 }
 0x683   :  { %v420_v60 = vadd.f32 1.0, %v2511_v59 }
 0x685   :  { %2512 = vrcp.f32 %v420_v60 }
 0x68f   :  { %v2513_v61 = vpop.eup %2512 }
 0x690   :  { %v427_v3 = vmul.f32 %v2513_v61, %v425_v2 }
 0x6f3   :  { %v430_v62 = vpop.permute.xlu0 %429 }
 0x6f4   :  { %v432_v63 = vmul.f32 %v2513_v61, %v430_v62 }
 0x6f6   :  { %434 = vrot.lane.b32.xlu1 %v432_v63, %s2674_s0 }
 0x768   :  { %v435_v4 = vpop.permute.xlu1 %434 }
 0x769   :  { %v437_v6 = vadd.f32 %v435_v4, %v427_v3 }
 0x76b   :  { %2514 = vtanh.f32 %v437_v6  ;;  %v537_v26 = vrot.slane %v437_v6, 6 }
 0x775   :  { %v2515_v7 = vpop.eup %2514 }
 0x776   :  { %440 = vrot.lane.b32.xlu0 %v2515_v7, %s2674_s0 }
 0x7e8   :  { %v441_v8 = vpop.permute.xlu0 %440 }
 0x7e9   :  { %v2771_v9 = vmul.f32 %v2513_v61, %v441_v8 }
 0x7eb   :  { %v450_v11 = vrot.slane %v2771_v9, 4 }
 0x7ed   :  { %451 = vrot.lane.b32.xlu1 %v450_v11, %s2675_s26 }
 0x85f   :  { %v452_v12 = vpop.permute.xlu1 %451 }
 0x860   :  { %2217 = vmatmul.mubr.msk.f32.vlgmr.msra.gmra.mrb[4].mxu0 %vm124_vm4, %v452_v12 }
 0x861   :  { %2405 = vmatpush3.bf16.msra.mxu0 %v2707_v5  ;;  %2238 = vmatprep.mubr.msk.f32.mxu0 %vm2672_vm0, %v2673_v1 }
 0x862   :  { %2406 = vmatprep.subr.bf16.mxu0 %v2671_v0 }
 0x865   :  { %2408 = vmatpush3.bf16.msra.mxu0 %v2716_v10 }
 0x866   :  { %2415 = vmatprep.subr.bf16.mxu0 %v2671_v0 }
 0x933   :  { %v521_v14 = vpop.f32.mrb[4].mxu0 }
 0x934   :  { %v526_v16 = vrot.slane %v521_v14, 2  ;;  %v2218_v17 = vpop.f32.mrb[5].mxu0 }
 0x936   :  { %v528_v18 = vadd.f32 %v526_v16, %v2737_v15 }
 0x938   :  { %2516 = vtanh.f32 %v528_v18  ;;  %v2047_v20 = vmul.f32 -1.442695, %v528_v18 }
 0x93a   :  { %2518 = vpow2.f32 %v2047_v20 }
 0x942   :  { %v2517_v19 = vpop.eup %2516 }
 0x943   :  { %541 = vrot.lane.b32.xlu0 %v2517_v19, %s2674_s0 }
 0x944   :  { %v2519_v21 = vpop.eup %2518 }
 0x945   :  { %v532_v22 = vadd.f32 1.0, %v2519_v21 }
 0x947   :  { %2520 = vrcp.f32 %v532_v22 }
 0x951   :  { %v2521_v23 = vpop.eup %2520 }
 0x952   :  { %v539_v27 = vmul.f32 %v2521_v23, %v537_v26 }
 0x9b5   :  { %v542_v24 = vpop.permute.xlu0 %541 }
 0x9b6   :  { %v544_v25 = vmul.f32 %v2521_v23, %v542_v24 }
 0x9b8   :  { %546 = vrot.lane.b32.xlu1 %v544_v25, %s2674_s0 }
 0xa2a   :  { %v547_v28 = vpop.permute.xlu1 %546 }
 0xa2b   :  { %v549_v29 = vadd.f32 %v547_v28, %v539_v27 }
 0xa2d   :  { %2522 = vtanh.f32 %v549_v29  ;;  %v646_v44 = vrot.slane %v549_v29, 6 }
 0xa37   :  { %v2523_v15 = vpop.eup %2522 }
 0xa38   :  { %552 = vrot.lane.b32.xlu0 %v2523_v15, %s2674_s0 }
 0xaaa   :  { %v553_v30 = vpop.permute.xlu0 %552 }
 0xaab   :  { %v2786_v31 = vmul.f32 %v2521_v23, %v553_v30 }
 0xaad   :  { %v562_v32 = vrot.slane %v2786_v31, 6 }
 0xaaf   :  { %563 = vrot.lane.b32.xlu1 %v562_v32, %s2675_s26 }
 0xb21   :  { %v564_v33 = vpop.permute.xlu1 %563 }
 0xb22   :  { %2228 = vmatmul.mubr.msk.f32.vlgmr.msra.gmra.mrb[4].mxu1 %vm124_vm4, %v564_v33 }
 0xb23   :  { %2411 = vmatpush3.bf16.msra.mxu1 %v2707_v5  ;;  %2249 = vmatprep.mubr.msk.f32.mxu1 %vm2672_vm0, %v2673_v1 }
 0xb24   :  { %2412 = vmatprep.subr.bf16.mxu1 %v2671_v0 }
 0xb27   :  { %2414 = vmatpush3.bf16.msra.mxu1 %v2716_v10 }
 0xbf5   :  { %v633_v34 = vpop.f32.mrb[4].mxu1 }
 0xbf6   :  { %v637_v35 = vadd.f32 %v633_v34, %v2735_v13  ;;  %v2229_v36 = vpop.f32.mrb[5].mxu1 }
 0xbf8   :  { %2524 = vtanh.f32 %v637_v35  ;;  %v2049_v38 = vmul.f32 -1.442695, %v637_v35 }
 0xbfa   :  { %2526 = vpow2.f32 %v2049_v38 }
 0xc02   :  { %v2525_v37 = vpop.eup %2524 }
 0xc03   :  { %650 = vrot.lane.b32.xlu0 %v2525_v37, %s2674_s0 }
 0xc04   :  { %v2527_v39 = vpop.eup %2526 }
 0xc05   :  { %v641_v40 = vadd.f32 1.0, %v2527_v39 }
 0xc07   :  { %2528 = vrcp.f32 %v641_v40 }
 0xc11   :  { %v2529_v41 = vpop.eup %2528 }
 0xc12   :  { %v648_v45 = vmul.f32 %v2529_v41, %v646_v44 }
 0xc75   :  { %v651_v42 = vpop.permute.xlu0 %650 }
 0xc76   :  { %v653_v43 = vmul.f32 %v2529_v41, %v651_v42 }
 0xc78   :  { %655 = vrot.lane.b32.xlu1 %v653_v43, %s2674_s0 }
 0xcea   :  { %v656_v46 = vpop.permute.xlu1 %655 }
 0xceb   :  { %v658_v47 = vadd.f32 %v656_v46, %v648_v45 }
 0xced   :  { %2530 = vtanh.f32 %v658_v47 }
 0xcf7   :  { %v2531_v48 = vpop.eup %2530 }
 0xcf8   :  { %661 = vrot.lane.b32.xlu0 %v2531_v48, %s2674_s0 }
 0xd6a   :  { %v662_v49 = vpop.permute.xlu0 %661 }
 0xd6b   :  { %v664_v51 = vmul.f32 %v2529_v41, %v662_v49 }
 0xd6d   :  { %666 = vrot.lane.b32.xlu1 %v664_v51, %s2675_s26 }
 0xddf   :  { %v667_v52 = vpop.permute.xlu1 %666 }
 0xde0   :  { %669 = vst.msk [vmem:[#allocation2 + $0x8] sm:$0x3] %vm227_vm3, %v667_v52  ;;  %2239 = vmatmul.mubr.msk.f32.vlgmr.msra.gmra.mrb[6].mxu0 %vm124_vm4, %v667_v52  ;;  %v1001_v52 = vld [vmem:[#allocation3 + $0x38] sm:$0xff] }
 0xde1   :  { %2417 = vmatpush3.bf16.msra.mxu0 %v2707_v5  ;;  %2260 = vmatprep.mubr.msk.f32.mxu0 %vm2672_vm0, %v2673_v1 }
 0xde2   :  { %2418 = vmatprep.subr.bf16.mxu0 %v2671_v0 }
 0xde5   :  { %2420 = vmatpush3.bf16.msra.mxu0 %v2716_v10  ;;  %v754_v10 = vrot.slane %v658_v47, 6 }
 0xde6   :  { %2429 = vmatprep.subr.bf16.mxu0 %v2671_v0 }
 0xeb3   :  { %v738_v53 = vpop.f32.mrb[6].mxu0 }
 0xeb4   :  { %v743_v54 = vrot.slane %v738_v53, 6  ;;  %v2240_v55 = vpop.f32.mrb[7].mxu0 }
 0xeb5   :  { %v1005_v55 = vld [vmem:[#allocation3 + $0x58] sm:$0xff] }
 0xeb6   :  { %v745_v56 = vadd.f32 %v743_v54, %v2735_v13  ;;  %v1004_v54 = vld [vmem:[#allocation3 + $0x50] sm:$0xff] }
 0xeb8   :  { %2532 = vtanh.f32 %v745_v56  ;;  %v2051_v58 = vmul.f32 -1.442695, %v745_v56  ;;  %v1002_v56 = vld [vmem:[#allocation3 + $0x40] sm:$0xff] }
 0xeba   :  { %2534 = vpow2.f32 %v2051_v58  ;;  %v1003_v58 = vld [vmem:[#allocation3 + $0x48] sm:$0xff] }
 0xec2   :  { %v2533_v57 = vpop.eup %2532 }
 0xec3   :  { %758 = vrot.lane.b32.xlu0 %v2533_v57, %s2674_s0  ;;  %v2842_v57 = vpack.c.bf16 %v1005_v55, %v1004_v54 }
 0xec4   :  { %v2535_v5 = vpop.eup %2534 }
 0xec5   :  { %v749_v59 = vadd.f32 1.0, %v2535_v5  ;;  %v1006_v5 = vld [vmem:[#allocation3 + $0x60] sm:$0xff] }
 0xec7   :  { %2536 = vrcp.f32 %v749_v59  ;;  %v1007_v59 = vld [vmem:[#allocation3 + $0x68] sm:$0xff] }
 0xed1   :  { %v2537_v60 = vpop.eup %2536 }
 0xed2   :  { %v756_v63 = vmul.f32 %v2537_v60, %v754_v10 }
 0xf35   :  { %v759_v61 = vpop.permute.xlu0 %758 }
 0xf36   :  { %v761_v62 = vmul.f32 %v2537_v60, %v759_v61 }
 0xf38   :  { %763 = vrot.lane.b32.xlu1 %v761_v62, %s2674_s0 }
 0xfaa   :  { %v764_v2 = vpop.permute.xlu1 %763 }
 0xfab   :  { %v766_v3 = vadd.f32 %v764_v2, %v756_v63 }
 0xfad   :  { %2538 = vtanh.f32 %v766_v3  ;;  %v865_v25 = vrot.slane %v766_v3, 6 }
 0xfb7   :  { %v2539_v4 = vpop.eup %2538 }
 0xfb8   :  { %769 = vrot.lane.b32.xlu0 %v2539_v4, %s2674_s0 }
0x102a   :  { %v770_v6 = vpop.permute.xlu0 %769 }
0x102b   :  { %v2813_v7 = vmul.f32 %v2537_v60, %v770_v6  ;;  %v2425_v60 = vpack.c.bf16 %v1003_v58, %v1002_v56 }
0x102d   :  { %v778_v8 = vrot.slane %v2813_v7, 2 }
0x102f   :  { %779 = vrot.lane.b32.xlu1 %v778_v8, %s2675_s26  ;;  %v2056_v8 = vld [vmem:[#allocation3 + $0x70] ss:$0 sm:$0xff] }
0x10a1   :  { %v780_v11 = vpop.permute.xlu1 %779 }
0x10a2   :  { %2250 = vmatmul.mubr.msk.f32.vlgmr.msra.gmra.mrb[6].mxu1 %vm124_vm4, %v780_v11 }
0x1175   :  { %v849_v12 = vpop.f32.mrb[6].mxu1 }
0x1176   :  { %v854_v14 = vrot.slane %v849_v12, 4  ;;  %v2251_v16 = vpop.f32.mrb[7].mxu1 }
0x1178   :  { %v856_v17 = vadd.f32 %v854_v14, %v2735_v13 }
0x117a   :  { %2540 = vtanh.f32 %v856_v17  ;;  %v2053_v19 = vmul.f32 -1.442695, %v856_v17 }
0x117c   :  { %2542 = vpow2.f32 %v2053_v19 }
0x1184   :  { %v2541_v18 = vpop.eup %2540 }
0x1185   :  { %869 = vrot.lane.b32.xlu0 %v2541_v18, %s2674_s0 }
0x1186   :  { %v2543_v20 = vpop.eup %2542 }
0x1187   :  { %v860_v21 = vadd.f32 1.0, %v2543_v20 }
0x1189   :  { %2544 = vrcp.f32 %v860_v21 }
0x1193   :  { %v2545_v22 = vpop.eup %2544 }
0x1194   :  { %v867_v26 = vmul.f32 %v2545_v22, %v865_v25 }
0x11f7   :  { %v870_v23 = vpop.permute.xlu0 %869 }
0x11f8   :  { %v872_v24 = vmul.f32 %v2545_v22, %v870_v23 }
0x11fa   :  { %874 = vrot.lane.b32.xlu1 %v872_v24, %s2674_s0 }
0x126c   :  { %v875_v27 = vpop.permute.xlu1 %874 }
0x126d   :  { %v877_v28 = vadd.f32 %v875_v27, %v867_v26 }
0x126f   :  { %2546 = vtanh.f32 %v877_v28 }
0x1279   :  { %v2547_v29 = vpop.eup %2546 }
0x127a   :  { %880 = vrot.lane.b32.xlu0 %v2547_v29, %s2674_s0 }
0x12ec   :  { %v881_v15 = vpop.permute.xlu0 %880 }
0x12ed   :  { %v883_v30 = vmul.f32 %v2545_v22, %v881_v15 }
0x12ef   :  { %v889_v32 = vrot.slane %v883_v30, 4 }
0x12f1   :  { %890 = vrot.lane.b32.xlu1 %v889_v32, %s2675_s26 }
0x1363   :  { %v891_v33 = vpop.permute.xlu1 %890 }
0x1364   :  { %2261 = vmatmul.mubr.msk.f32.vlgmr.msra.gmra.mrb[8].mxu0 %vm124_vm4, %v891_v33 }
0x1365   :  { %2282 = vmatprep.mubr.msk.f32.mxu0 %vm2672_vm0, %v2673_v1  ;;  %2431 = vmatpush3.bf16.msra.mxu0 %v2842_v57 }
0x1366   :  { %2432 = vmatprep.subr.bf16.mxu0 %v2671_v0 }
0x1437   :  { %v960_v34 = vpop.f32.mrb[8].mxu0 }
0x1438   :  { %v965_v35 = vrot.slane %v960_v34, 2  ;;  %v2262_v36 = vpop.f32.mrb[9].mxu0 }
0x143a   :  { %v967_v37 = vadd.f32 %v965_v35, %v2735_v13  ;;  %v976_v13 = vrot.slane %v877_v28, 6 }
0x143c   :  { %2548 = vtanh.f32 %v967_v37  ;;  %v2055_v39 = vmul.f32 -1.442695, %v967_v37 }
0x143e   :  { %2550 = vpow2.f32 %v2055_v39 }
0x1446   :  { %v2549_v38 = vpop.eup %2548 }
0x1447   :  { %980 = vrot.lane.b32.xlu0 %v2549_v38, %s2674_s0 }
0x1448   :  { %v2551_v40 = vpop.eup %2550 }
0x1449   :  { %v971_v41 = vadd.f32 1.0, %v2551_v40 }
0x144b   :  { %2552 = vrcp.f32 %v971_v41 }
0x1455   :  { %v2553_v42 = vpop.eup %2552 }
0x1456   :  { %v978_v45 = vmul.f32 %v2553_v42, %v976_v13 }
0x14b9   :  { %v981_v43 = vpop.permute.xlu0 %980 }
0x14ba   :  { %v983_v44 = vmul.f32 %v2553_v42, %v981_v43 }
0x14bc   :  { %985 = vrot.lane.b32.xlu1 %v983_v44, %s2674_s0 }
0x14c0   :  { %333 = vrot.lane.b32.xlu1 %v2756_v50, %s2675_s26 }
0x14c4   :  { %557 = vrot.lane.b32.xlu1 %v2786_v31, %s2675_s26  ;;  %v1000_v31 = vld [vmem:[#allocation3 + $0x30] sm:$0xff] }
0x14c5   :  { %v2421_v53 = vpack.c.bf16 %v1001_v52, %v1000_v31 }
0x14c7   :  { %2422 = vmatprep.subr.bf16.mxu1 %v2421_v53 }
0x14c8   :  { %885 = vrot.lane.b32.xlu1 %v883_v30, %s2675_s26  ;;  %2424 = vmatpush3.bf16.msra.mxu1 %v2421_v53 }
0x14c9   :  { %2426 = vmatprep.subr.bf16.mxu1 %v2425_v60 }
0x14cc   :  { %2428 = vmatpush3.bf16.msra.mxu1 %v2425_v60 }
0x14cd   :  { %2435 = vmatprep.subr.bf16.mxu1 %v2671_v0 }
0x152e   :  { %v986_v46 = vpop.permute.xlu1 %985 }
0x152f   :  { %v988_v47 = vadd.f32 %v986_v46, %v978_v45 }
0x1531   :  { %2554 = vtanh.f32 %v988_v47 }
0x1532   :  { %v334_v48 = vpop.permute.xlu1 %333 }
0x1533   :  { %337 = vst.msk [vmem:[#allocation2] sm:$0xc] %vm336_vm5, %v334_v48 }
0x1536   :  { %v558_v49 = vpop.permute.xlu1 %557 }
0x1537   :  { %561 = vst.msk [vmem:[#allocation2] sm:$0xc0] %vm560_vm6, %v558_v49 }
0x153a   :  { %v886_v50 = vpop.permute.xlu1 %885 }
0x153b   :  { %v2555_v51 = vpop.eup %2554  ;;  %888 = vst.msk [vmem:[#allocation2 + $0x8] sm:$0x30] %vm448_vm7, %v886_v50 }
0x153c   :  { %991 = vrot.lane.b32.xlu0 %v2555_v51, %s2674_s0 }
0x1540   :  { %445 = vrot.lane.b32.xlu0 %v2771_v9, %s2675_s26  ;;  %v2845_v9 = vpack.c.bf16 %v1007_v59, %v1006_v5 }
0x1542   :  { %2434 = vmatpush3.bf16.msra.mxu0 %v2845_v9 }
0x1543   :  { %2441 = vmatprep.subr.bf16.mxu0 %v2671_v0 }
0x1544   :  { %774 = vrot.lane.b32.xlu0 %v2813_v7, %s2675_s26 }
0x1545   :  { %2283 = vmatmul.mubr.f32.vlgmr.msra.gmra.mrb[10].mxu0 %v2673_v1 }
0x1546   :  { %2443 = vmatpush3.bf16.msra.mxu0 %v2842_v57  ;;  %2304 = vmatprep.mubr.msk.f32.mxu0 %vm2672_vm0, %v2673_v1 }
0x1547   :  { %2444 = vmatprep.subr.bf16.mxu0 %v2671_v0 }
0x154a   :  { %2446 = vmatpush3.bf16.msra.mxu0 %v2845_v9 }
0x154b   :  { %2453 = vmatprep.subr.bf16.mxu0 %v2671_v0 }
0x15ae   :  { %v992_v61 = vpop.permute.xlu0 %991 }
0x15af   :  { %v994_v62 = vmul.f32 %v2553_v42, %v992_v61 }
0x15b1   :  { %996 = vrot.lane.b32.xlu0 %v994_v62, %s2675_s26 }
0x15b2   :  { %v446_v10 = vpop.permute.xlu0 %445 }
0x15b3   :  { %449 = vst.msk [vmem:[#allocation2] sm:$0x30] %vm448_vm7, %v446_v10 }
0x15b6   :  { %v775_v63 = vpop.permute.xlu0 %774 }
0x15b7   :  { %777 = vst.msk [vmem:[#allocation2 + $0x8] sm:$0xc] %vm336_vm5, %v775_v63 }
0x15ba   :  { %v1009_v2 = vld [vmem:[#allocation2] sm:$0xff] }
0x15bb   :  { %2271 = vmatprep.mubr.msk.f32.mxu1 %vm124_vm4, %v1009_v2 }
0x1618   :  { %v1162_v6 = vpop.f32.mrb[10].mxu0 }
0x1619   :  { %v2284_v7 = vpop.f32.mrb[11].mxu0 }
0x1623   :  { %v997_v3 = vpop.permute.xlu0 %996 }
0x1624   :  { %999 = vst.msk [vmem:[#allocation2 + $0x8] sm:$0xc0] %vm560_vm6, %v997_v3 }
0x162b   :  { %v1010_v4 = vld [vmem:[#allocation2 + $0x8] sm:$0xff] }
0x162c   :  { %2272 = vmatmul.mubr.msk.f32.vlgmr.msra.gmra.mrb[8].mxu1 %vm124_vm4, %v1010_v4 }
0x162d   :  { %2437 = vmatpush3.bf16.msra.mxu1 %v2842_v57  ;;  %2293 = vmatprep.mubr.msk.f32.mxu1 %vm2672_vm0, %v2673_v1 }
0x162e   :  { %2438 = vmatprep.subr.bf16.mxu1 %v2671_v0 }
0x1631   :  { %2440 = vmatpush3.bf16.msra.mxu1 %v2845_v9 }
0x1632   :  { %2447 = vmatprep.subr.bf16.mxu1 %v2671_v0 }
0x16ff   :  { %v2273_v11 = vpop.f32.mrb[8].mxu1 }
0x1700   :  { %v2870_v12 = vadd.f32 %v2273_v11, %v2056_v8  ;;  %v1087_v14 = vpop.f32.mrb[9].mxu1 }
0x1701   :  { %v2872_v16 = vadd.f32 %v2056_v8, %v1087_v14 }
0x1703   :  { %v1166_v17 = vadd.f32 %v1162_v6, %v2872_v16 }
0x1705   :  { %2556 = vtanh.f32 %v1166_v17  ;;  %v2059_v19 = vmul.f32 -1.442695, %v1166_v17 }
0x1707   :  { %2558 = vpow2.f32 %v2059_v19 }
0x170f   :  { %v2557_v18 = vpop.eup %2556 }
0x1710   :  { %1176 = vrot.lane.b32.xlu1 %v2557_v18, %s2674_s0 }
0x1711   :  { %v2559_v20 = vpop.eup %2558 }
0x1712   :  { %v1170_v21 = vadd.f32 1.0, %v2559_v20 }
0x1714   :  { %2560 = vrcp.f32 %v1170_v21 }
0x171e   :  { %v2561_v22 = vpop.eup %2560 }
0x171f   :  { %v1174_v25 = vmul.f32 0.0, %v2561_v22 }
0x1782   :  { %v1177_v23 = vpop.permute.xlu1 %1176 }
0x1783   :  { %v1179_v24 = vmul.f32 %v2561_v22, %v1177_v23 }
0x1785   :  { %1181 = vrot.lane.b32.xlu0 %v1179_v24, %s2674_s0 }
0x17f7   :  { %v1182_v26 = vpop.permute.xlu0 %1181 }
0x17f8   :  { %v1184_v27 = vadd.f32 %v1182_v26, %v1174_v25 }
0x17fa   :  { %2562 = vtanh.f32 %v1184_v27  ;;  %v1278_v43 = vrot.slane %v1184_v27, 6 }
0x1804   :  { %v2563_v28 = vpop.eup %2562 }
0x1805   :  { %1187 = vrot.lane.b32.xlu1 %v2563_v28, %s2674_s0 }
0x1877   :  { %v1188_v29 = vpop.permute.xlu1 %1187 }
0x1878   :  { %v1190_v15 = vmul.f32 %v2561_v22, %v1188_v29 }
0x187a   :  { %1192 = vrot.lane.b32.xlu0 %v1190_v15, %s2675_s26 }
0x18ec   :  { %v1193_v30 = vpop.permute.xlu0 %1192 }
0x18ed   :  { %2294 = vmatmul.mubr.msk.f32.vlgmr.msra.gmra.mrb[10].mxu1 %vm124_vm4, %v1193_v30 }
0x18ee   :  { %2449 = vmatpush3.bf16.msra.mxu1 %v2842_v57  ;;  %2315 = vmatprep.mubr.msk.f32.mxu1 %vm2672_vm0, %v2673_v1 }
0x18ef   :  { %2450 = vmatprep.subr.bf16.mxu1 %v2671_v0 }
0x18f2   :  { %2452 = vmatpush3.bf16.msra.mxu1 %v2845_v9 }
0x18f3   :  { %2459 = vmatprep.subr.bf16.mxu1 %v2671_v0 }
0x19c0   :  { %v1262_v32 = vpop.f32.mrb[10].mxu1 }
0x19c1   :  { %v1267_v33 = vrot.slane %v1262_v32, 6  ;;  %v2295_v34 = vpop.f32.mrb[11].mxu1 }
0x19c3   :  { %v1269_v35 = vadd.f32 %v1267_v33, %v2872_v16 }
0x19c5   :  { %2564 = vtanh.f32 %v1269_v35  ;;  %v2061_v37 = vmul.f32 -1.442695, %v1269_v35 }
0x19c7   :  { %2566 = vpow2.f32 %v2061_v37 }
0x19cf   :  { %v2565_v36 = vpop.eup %2564 }
0x19d0   :  { %1282 = vrot.lane.b32.xlu1 %v2565_v36, %s2674_s0 }
0x19d1   :  { %v2567_v38 = vpop.eup %2566 }
0x19d2   :  { %v1273_v39 = vadd.f32 1.0, %v2567_v38 }
0x19d4   :  { %2568 = vrcp.f32 %v1273_v39 }
0x19de   :  { %v2569_v40 = vpop.eup %2568 }
0x19df   :  { %v1280_v44 = vmul.f32 %v2569_v40, %v1278_v43 }
0x1a42   :  { %v1283_v41 = vpop.permute.xlu1 %1282 }
0x1a43   :  { %v1285_v42 = vmul.f32 %v2569_v40, %v1283_v41 }
0x1a45   :  { %1287 = vrot.lane.b32.xlu0 %v1285_v42, %s2674_s0 }
0x1ab7   :  { %v1288_v13 = vpop.permute.xlu0 %1287 }
0x1ab8   :  { %v1290_v45 = vadd.f32 %v1288_v13, %v1280_v44 }
0x1aba   :  { %2570 = vtanh.f32 %v1290_v45  ;;  %v1385_v61 = vrot.slane %v1290_v45, 6 }
0x1ac4   :  { %v2571_v46 = vpop.eup %2570 }
0x1ac5   :  { %1293 = vrot.lane.b32.xlu1 %v2571_v46, %s2674_s0 }
0x1b37   :  { %v1294_v47 = vpop.permute.xlu1 %1293 }
0x1b38   :  { %v1296_v48 = vmul.f32 %v2569_v40, %v1294_v47 }
0x1b3a   :  { %v1298_v49 = vrot.slane %v1296_v48, 2 }
0x1b3c   :  { %1299 = vrot.lane.b32.xlu0 %v1298_v49, %s2675_s26 }
0x1bae   :  { %v1300_v50 = vpop.permute.xlu0 %1299 }
0x1baf   :  { %2305 = vmatmul.mubr.msk.f32.vlgmr.msra.gmra.mrb[12].mxu0 %vm124_vm4, %v1300_v50 }
0x1bb0   :  { %2455 = vmatpush3.bf16.msra.mxu0 %v2842_v57  ;;  %2326 = vmatprep.mubr.msk.f32.mxu0 %vm2672_vm0, %v2673_v1 }
0x1bb1   :  { %2456 = vmatprep.subr.bf16.mxu0 %v2671_v0 }
0x1bb4   :  { %2458 = vmatpush3.bf16.msra.mxu0 %v2845_v9 }
0x1bb5   :  { %2465 = vmatprep.subr.bf16.mxu0 %v2671_v0 }
0x1c82   :  { %v1369_v51 = vpop.f32.mrb[12].mxu0 }
0x1c83   :  { %v1374_v31 = vrot.slane %v1369_v51, 4  ;;  %v2306_v52 = vpop.f32.mrb[13].mxu0 }
0x1c85   :  { %v1376_v53 = vadd.f32 %v1374_v31, %v2872_v16 }
0x1c87   :  { %2572 = vtanh.f32 %v1376_v53  ;;  %v2063_v55 = vmul.f32 -1.442695, %v1376_v53 }
0x1c89   :  { %2574 = vpow2.f32 %v2063_v55 }
0x1c91   :  { %v2573_v54 = vpop.eup %2572 }
0x1c92   :  { %1389 = vrot.lane.b32.xlu1 %v2573_v54, %s2674_s0 }
0x1c93   :  { %v2575_v56 = vpop.eup %2574 }
0x1c94   :  { %v1380_v58 = vadd.f32 1.0, %v2575_v56 }
0x1c96   :  { %2576 = vrcp.f32 %v1380_v58 }
0x1ca0   :  { %v2577_v5 = vpop.eup %2576 }
0x1ca1   :  { %v1387_v62 = vmul.f32 %v2577_v5, %v1385_v61 }
0x1d04   :  { %v1390_v59 = vpop.permute.xlu1 %1389 }
0x1d05   :  { %v1392_v60 = vmul.f32 %v2577_v5, %v1390_v59 }
0x1d07   :  { %1394 = vrot.lane.b32.xlu0 %v1392_v60, %s2674_s0 }
0x1d79   :  { %v1395_v10 = vpop.permute.xlu0 %1394 }
0x1d7a   :  { %v1397_v63 = vadd.f32 %v1395_v10, %v1387_v62 }
0x1d7c   :  { %2578 = vtanh.f32 %v1397_v63  ;;  %v1492_v25 = vrot.slane %v1397_v63, 6 }
0x1d86   :  { %v2579_v2 = vpop.eup %2578 }
0x1d87   :  { %1400 = vrot.lane.b32.xlu1 %v2579_v2, %s2674_s0 }
0x1df9   :  { %v1401_v3 = vpop.permute.xlu1 %1400 }
0x1dfa   :  { %v1403_v4 = vmul.f32 %v2577_v5, %v1401_v3 }
0x1dfc   :  { %v1405_v6 = vrot.slane %v1403_v4, 4 }
0x1dfe   :  { %1406 = vrot.lane.b32.xlu0 %v1405_v6, %s2675_s26 }
0x1e70   :  { %v1407_v7 = vpop.permute.xlu0 %1406 }
0x1e71   :  { %2316 = vmatmul.mubr.msk.f32.vlgmr.msra.gmra.mrb[12].mxu1 %vm124_vm4, %v1407_v7 }
0x1e72   :  { %2461 = vmatpush3.bf16.msra.mxu1 %v2842_v57  ;;  %2337 = vmatprep.mubr.msk.f32.mxu1 %vm2672_vm0, %v2673_v1 }
0x1e73   :  { %2462 = vmatprep.subr.bf16.mxu1 %v2671_v0 }
0x1e76   :  { %2464 = vmatpush3.bf16.msra.mxu1 %v2845_v9 }
0x1e77   :  { %2471 = vmatprep.subr.bf16.mxu1 %v2671_v0 }
0x1f44   :  { %v1476_v8 = vpop.f32.mrb[12].mxu1 }
0x1f45   :  { %v1481_v11 = vrot.slane %v1476_v8, 2  ;;  %v2317_v14 = vpop.f32.mrb[13].mxu1 }
0x1f47   :  { %v1483_v17 = vadd.f32 %v1481_v11, %v2872_v16 }
0x1f49   :  { %2580 = vtanh.f32 %v1483_v17  ;;  %v2065_v19 = vmul.f32 -1.442695, %v1483_v17 }
0x1f4b   :  { %2582 = vpow2.f32 %v2065_v19 }
0x1f53   :  { %v2581_v18 = vpop.eup %2580 }
0x1f54   :  { %1496 = vrot.lane.b32.xlu1 %v2581_v18, %s2674_s0 }
0x1f55   :  { %v2583_v20 = vpop.eup %2582 }
0x1f56   :  { %v1487_v21 = vadd.f32 1.0, %v2583_v20 }
0x1f58   :  { %2584 = vrcp.f32 %v1487_v21 }
0x1f62   :  { %v2585_v22 = vpop.eup %2584 }
0x1f63   :  { %v1494_v26 = vmul.f32 %v2585_v22, %v1492_v25 }
0x1fc6   :  { %v1497_v23 = vpop.permute.xlu1 %1496 }
0x1fc7   :  { %v1499_v24 = vmul.f32 %v2585_v22, %v1497_v23 }
0x1fc9   :  { %1501 = vrot.lane.b32.xlu0 %v1499_v24, %s2674_s0 }
0x203b   :  { %v1502_v27 = vpop.permute.xlu0 %1501 }
0x203c   :  { %v1504_v28 = vadd.f32 %v1502_v27, %v1494_v26 }
0x203e   :  { %2586 = vtanh.f32 %v1504_v28  ;;  %v1596_v43 = vrot.slane %v1504_v28, 6 }
0x2048   :  { %v2587_v16 = vpop.eup %2586 }
0x2049   :  { %1507 = vrot.lane.b32.xlu1 %v2587_v16, %s2674_s0 }
0x20bb   :  { %v1508_v29 = vpop.permute.xlu1 %1507 }
0x20bc   :  { %v1510_v15 = vmul.f32 %v2585_v22, %v1508_v29 }
0x20be   :  { %v1512_v30 = vrot.slane %v1510_v15, 6 }
0x20c0   :  { %1513 = vrot.lane.b32.xlu0 %v1512_v30, %s2675_s26 }
0x2132   :  { %v1514_v32 = vpop.permute.xlu0 %1513 }
0x2133   :  { %2327 = vmatmul.mubr.msk.f32.vlgmr.msra.gmra.mrb[14].mxu0 %vm124_vm4, %v1514_v32 }
0x2134   :  { %2467 = vmatpush3.bf16.msra.mxu0 %v2842_v57  ;;  %2348 = vmatprep.mubr.msk.f32.mxu0 %vm2672_vm0, %v2673_v1 }
0x2135   :  { %2468 = vmatprep.subr.bf16.mxu0 %v2671_v0 }
0x2138   :  { %2470 = vmatpush3.bf16.msra.mxu0 %v2845_v9 }
0x2139   :  { %2477 = vmatprep.subr.bf16.mxu0 %v2671_v0 }
0x2206   :  { %v1583_v33 = vpop.f32.mrb[14].mxu0 }
0x2207   :  { %v1587_v34 = vadd.f32 %v1583_v33, %v2870_v12  ;;  %v2328_v35 = vpop.f32.mrb[15].mxu0 }
0x2209   :  { %2588 = vtanh.f32 %v1587_v34  ;;  %v2067_v37 = vmul.f32 -1.442695, %v1587_v34 }
0x220b   :  { %2590 = vpow2.f32 %v2067_v37 }
0x2213   :  { %v2589_v36 = vpop.eup %2588 }
0x2214   :  { %1600 = vrot.lane.b32.xlu1 %v2589_v36, %s2674_s0 }
0x2215   :  { %v2591_v38 = vpop.eup %2590 }
0x2216   :  { %v1591_v39 = vadd.f32 1.0, %v2591_v38 }
0x2218   :  { %2592 = vrcp.f32 %v1591_v39 }
0x2222   :  { %v2593_v40 = vpop.eup %2592 }
0x2223   :  { %v1598_v44 = vmul.f32 %v2593_v40, %v1596_v43 }
0x2286   :  { %v1601_v41 = vpop.permute.xlu1 %1600 }
0x2287   :  { %v1603_v42 = vmul.f32 %v2593_v40, %v1601_v41 }
0x2289   :  { %1605 = vrot.lane.b32.xlu0 %v1603_v42, %s2674_s0 }
0x22fb   :  { %v1606_v13 = vpop.permute.xlu0 %1605 }
0x22fc   :  { %v1608_v45 = vadd.f32 %v1606_v13, %v1598_v44  ;;  %v1936_v44 = vld [vmem:[#allocation3 + $0x80] sm:$0xff]  ;;  %v1937_v13 = vld [vmem:[#allocation3 + $0x88] sm:$0xff] }
0x22fe   :  { %2594 = vtanh.f32 %v1608_v45 }
0x2308   :  { %v2595_v46 = vpop.eup %2594 }
0x2309   :  { %1611 = vrot.lane.b32.xlu1 %v2595_v46, %s2674_s0  ;;  %v1938_v46 = vld [vmem:[#allocation3 + $0x90] sm:$0xff] }
0x237b   :  { %v1612_v47 = vpop.permute.xlu1 %1611 }
0x237c   :  { %v1614_v48 = vmul.f32 %v2593_v40, %v1612_v47  ;;  %v2481_v47 = vpack.c.bf16 %v1938_v46, %v1937_v13 }
0x237e   :  { %1616 = vrot.lane.b32.xlu0 %v1614_v48, %s2675_s26 }
0x23f0   :  { %v1617_v49 = vpop.permute.xlu0 %1616 }
0x23f1   :  { %2338 = vmatmul.mubr.msk.f32.vlgmr.msra.gmra.mrb[14].mxu1 %vm124_vm4, %v1617_v49 }
0x23f2   :  { %2473 = vmatpush3.bf16.msra.mxu1 %v2842_v57  ;;  %2359 = vmatprep.mubr.msk.f32.mxu1 %vm2672_vm0, %v2673_v1 }
0x23f3   :  { %2474 = vmatprep.subr.bf16.mxu1 %v2671_v0 }
0x23f6   :  { %2476 = vmatpush3.bf16.msra.mxu1 %v2845_v9  ;;  %v1702_v9 = vrot.slane %v1608_v45, 6 }
0x24c4   :  { %v1686_v50 = vpop.f32.mrb[14].mxu1 }
0x24c5   :  { %v1691_v51 = vrot.slane %v1686_v50, 6  ;;  %v2339_v31 = vpop.f32.mrb[15].mxu1 }
0x24c7   :  { %v1693_v52 = vadd.f32 %v1691_v51, %v2870_v12 }
0x24c9   :  { %2596 = vtanh.f32 %v1693_v52  ;;  %v2069_v54 = vmul.f32 -1.442695, %v1693_v52  ;;  %v2074_v52 = vld [vmem:[#allocation3 + $0x98] ss:$0 sm:$0xff] }
0x24cb   :  { %2598 = vpow2.f32 %v2069_v54 }
0x24d3   :  { %v2597_v53 = vpop.eup %2596 }
0x24d4   :  { %1706 = vrot.lane.b32.xlu1 %v2597_v53, %s2674_s0 }
0x24d5   :  { %v2599_v55 = vpop.eup %2598 }
0x24d6   :  { %v1697_v57 = vadd.f32 1.0, %v2599_v55 }
0x24d8   :  { %2600 = vrcp.f32 %v1697_v57 }
0x24e2   :  { %v2601_v56 = vpop.eup %2600 }
0x24e3   :  { %v1704_v59 = vmul.f32 %v2601_v56, %v1702_v9 }
0x2546   :  { %v1707_v58 = vpop.permute.xlu1 %1706 }
0x2547   :  { %v1709_v5 = vmul.f32 %v2601_v56, %v1707_v58 }
0x2549   :  { %1711 = vrot.lane.b32.xlu0 %v1709_v5, %s2674_s0 }
0x25bb   :  { %v1712_v60 = vpop.permute.xlu0 %1711 }
0x25bc   :  { %v1714_v61 = vadd.f32 %v1712_v60, %v1704_v59 }
0x25be   :  { %2602 = vtanh.f32 %v1714_v61 }
0x25c8   :  { %v2603_v62 = vpop.eup %2602 }
0x25c9   :  { %1717 = vrot.lane.b32.xlu1 %v2603_v62, %s2674_s0 }
0x263b   :  { %v1718_v10 = vpop.permute.xlu1 %1717 }
0x263c   :  { %v1720_v63 = vmul.f32 %v2601_v56, %v1718_v10 }
0x263e   :  { %v1722_v2 = vrot.slane %v1720_v63, 2 }
0x2640   :  { %1723 = vrot.lane.b32.xlu0 %v1722_v2, %s2675_s26 }
0x26b2   :  { %v1724_v3 = vpop.permute.xlu0 %1723 }
0x26b3   :  { %2349 = vmatmul.mubr.msk.f32.vlgmr.msra.gmra.mrb[16].mxu0 %vm124_vm4, %v1724_v3 }
0x26b4   :  { %2370 = vmatprep.mubr.msk.f32.mxu0 %vm2672_vm0, %v2673_v1  ;;  %v1809_v1 = vrot.slane %v1714_v61, 6 }
0x2786   :  { %v1793_v4 = vpop.f32.mrb[16].mxu0 }
0x2787   :  { %v1798_v6 = vrot.slane %v1793_v4, 4  ;;  %v2350_v7 = vpop.f32.mrb[17].mxu0 }
0x2789   :  { %v1800_v8 = vadd.f32 %v1798_v6, %v2870_v12 }
0x278b   :  { %2604 = vtanh.f32 %v1800_v8  ;;  %v2071_v14 = vmul.f32 -1.442695, %v1800_v8 }
0x278d   :  { %2606 = vpow2.f32 %v2071_v14 }
0x2795   :  { %v2605_v11 = vpop.eup %2604 }
0x2796   :  { %1813 = vrot.lane.b32.xlu1 %v2605_v11, %s2674_s0 }
0x2797   :  { %v2607_v17 = vpop.eup %2606 }
0x2798   :  { %v1804_v18 = vadd.f32 1.0, %v2607_v17 }
0x279a   :  { %2608 = vrcp.f32 %v1804_v18 }
0x27a4   :  { %v2609_v19 = vpop.eup %2608 }
0x27a5   :  { %v1811_v22 = vmul.f32 %v2609_v19, %v1809_v1 }
0x2808   :  { %v1814_v20 = vpop.permute.xlu1 %1813 }
0x2809   :  { %v1816_v21 = vmul.f32 %v2609_v19, %v1814_v20 }
0x280b   :  { %1818 = vrot.lane.b32.xlu0 %v1816_v21, %s2674_s0 }
0x287d   :  { %v1819_v23 = vpop.permute.xlu0 %1818 }
0x287e   :  { %v1821_v24 = vadd.f32 %v1819_v23, %v1811_v22 }
0x2880   :  { %2610 = vtanh.f32 %v1821_v24  ;;  %v1916_v40 = vrot.slane %v1821_v24, 6 }
0x288a   :  { %v2611_v25 = vpop.eup %2610 }
0x288b   :  { %1824 = vrot.lane.b32.xlu1 %v2611_v25, %s2674_s0 }
0x28fd   :  { %v1825_v26 = vpop.permute.xlu1 %1824 }
0x28fe   :  { %v1827_v27 = vmul.f32 %v2609_v19, %v1825_v26 }
0x2900   :  { %v1829_v28 = vrot.slane %v1827_v27, 4 }
0x2902   :  { %1830 = vrot.lane.b32.xlu0 %v1829_v28, %s2675_s26 }
0x2974   :  { %v1831_v16 = vpop.permute.xlu0 %1830 }
0x2975   :  { %2360 = vmatmul.mubr.msk.f32.vlgmr.msra.gmra.mrb[16].mxu1 %vm124_vm4, %v1831_v16 }
0x2a48   :  { %v1900_v29 = vpop.f32.mrb[16].mxu1 }
0x2a49   :  { %v1905_v15 = vrot.slane %v1900_v29, 2  ;;  %v2361_v30 = vpop.f32.mrb[17].mxu1 }
0x2a4b   :  { %v1907_v32 = vadd.f32 %v1905_v15, %v2870_v12  ;;  %v1935_v12 = vld [vmem:[#allocation3 + $0x78] sm:$0xff] }
0x2a4c   :  { %v2478_v45 = vpack.c.bf16 %v1936_v44, %v1935_v12 }
0x2a4d   :  { %2612 = vtanh.f32 %v1907_v32  ;;  %v2073_v34 = vmul.f32 -1.442695, %v1907_v32 }
0x2a4e   :  { %2479 = vmatpush3.bf16.msra.mxu0 %v2478_v45 }
0x2a4f   :  { %2614 = vpow2.f32 %v2073_v34  ;;  %2480 = vmatprep.subr.bf16.mxu0 %v2671_v0 }
0x2a52   :  { %2482 = vmatpush3.bf16.msra.mxu0 %v2481_v47 }
0x2a57   :  { %v2613_v33 = vpop.eup %2612 }
0x2a58   :  { %1920 = vrot.lane.b32.xlu1 %v2613_v33, %s2674_s0 }
0x2a59   :  { %v2615_v35 = vpop.eup %2614 }
0x2a5a   :  { %v1911_v36 = vadd.f32 1.0, %v2615_v35 }
0x2a5c   :  { %2616 = vrcp.f32 %v1911_v36 }
0x2a66   :  { %v2617_v37 = vpop.eup %2616 }
0x2a67   :  { %v1918_v41 = vmul.f32 %v2617_v37, %v1916_v40 }
0x2aca   :  { %v1921_v38 = vpop.permute.xlu1 %1920 }
0x2acb   :  { %v1923_v39 = vmul.f32 %v2617_v37, %v1921_v38 }
0x2acd   :  { %1925 = vrot.lane.b32.xlu0 %v1923_v39, %s2674_s0 }
0x2b3f   :  { %v1926_v42 = vpop.permute.xlu0 %1925 }
0x2b40   :  { %v1928_v43 = vadd.f32 %v1926_v42, %v1918_v41 }
0x2b42   :  { %2618 = vtanh.f32 %v1928_v43 }
0x2b4c   :  { %v2619_v48 = vpop.eup %2618 }
0x2b4d   :  { %1931 = vrot.lane.b32.xlu1 %v2619_v48, %s2674_s0 }
0x2bbf   :  { %v1932_v49 = vpop.permute.xlu1 %1931 }
0x2bc0   :  { %v1934_v50 = vmul.f32 %v2617_v37, %v1932_v49 }
0x2bc2   :  { %v1945_v51 = vrot.slane %v1934_v50, 6 }
0x2bc4   :  { %1946 = vrot.lane.b32.xlu0 %v1945_v51, %s2675_s26 }
0x2c36   :  { %v1947_v31 = vpop.permute.xlu0 %1946 }
0x2c37   :  { %2371 = vmatmul.mubr.msk.f32.vlgmr.msra.gmra.mrb[18].mxu0 %vm124_vm4, %v1947_v31 }
0x2d0a   :  { %v2016_v53 = vpop.f32.mrb[18].mxu0 }
0x2d0b   :  { %v2017_v54 = vadd.f32 %v2074_v52, %v2016_v53  ;;  %v2372_v55 = vpop.f32.mrb[19].mxu0 }
0x2d0d   :  { %2021 = vst.msk [vmem:[#allocation6] sm:$0x3] %vm2020_vm8, %v2017_v54 }
0x2d0e   :  { %2653 = shalt.err (!%p2650_p12)
}
0x2d0f   :  { %s2654_s4 = scalar_lea.hbm %s2968_s2, 32 }
0x2d10   :  { %p2655_p13 = scmp.ne.s32.totalorder %s2968_s2, %s2654_s4  ;;  %p2658_p0 = scmp.lt.u32.totalorder %s2654_s4, %s2968_s2 }
0x2d12   :  { %p2660_p1 = pnand %p2658_p0, %p2655_p13 }
0x2d14   :  { %2663 = shalt.err (!%p2660_p1)
}
0x2d15   :  { %2031 = dma.vmem_to_hbm [thread:$0]  %s2029_s28, 32, %s2968_s2, [#allocation5]  }
0x2d16   :  { %2666 = dma.done.wait [#allocation5], 32  }
0x2d17   :  { %2667 = vsyncadd [#allocation5], 4294967264 }
0x2d18   :  { %2035 = vsyncpa [#allocation4], 1 }
0x2d19   :  { %2036 = vsyncpa [#allocation5], 1 }

</bundles_post_ra>
